<compile_context>
chip_gen: v7x
topology: tpu7x:2x2x1
jax: 0.10.0
libtpu: 0.0.40
codegen_flags: <defaults>
</compile_context>

<pallas_src>
import jax
import jax.numpy as jnp
from jax import lax
from jax.experimental import pallas as pl
from jax.experimental.pallas import tpu as pltpu


# dot_general dimension numbers (2-D, no batch dims)
NN = (((1,), (0,)), ((), ()))   # standard matmul
NT = (((1,), (1,)), ((), ()))   # rhs transposed (contract last dims of both)


def _dot(a, b, dims):
    return lax.dot_general(a, b, dims, preferred_element_type=jnp.float32)


def _small_linear(W, b_col, M):
    """W: (O, K), b: (O, 1), M: (K, N) -> W @ M + b, shape (O, N).
    O, K are tiny (O == 1 at these shapes), so each output row is one fused
    broadcast-multiply + sublane reduce; no MXU, no loop/concat when O == 1."""
    rows = [jnp.sum(W[o, :, None] * M, axis=0, keepdims=True)
            for o in range(W.shape[0])]
    out = rows[0] if len(rows) == 1 else jnp.concatenate(rows, axis=0)
    return out + b_col


def _small_linear_t(M, W, b_row):
    """M: (R, K), W: (O, K), b: (1, O) -> M @ W.T + b, shape (R, O).
    Transposed counterpart used by the channel branch (C stays on sublanes)."""
    cols = [jnp.sum(M * W[o, None, :], axis=1, keepdims=True)
            for o in range(W.shape[0])]
    out = cols[0] if len(cols) == 1 else jnp.concatenate(cols, axis=1)
    return out + b_row


# ----------------------------------------------------------------------------
# Pallas kernel: single invocation, batch folded into the lane axis.
# ----------------------------------------------------------------------------
def make_rga_kernel(B, C, HW, IC, IS, NS1, NC1):
    L = B * HW

    def kernel(x_ref, wps_ref, wggs_ref, wpc_ref, wggc_ref,
               sw_ref, bias_s_ref, bias_c_ref, o_ref):
        X = x_ref[...]                                     # (C, L) lane-dense

        # ------- unpack packed parameter slabs (static slices, no DMA) -------
        w_proj_s = wps_ref[...]                            # (3*IC, C)
        w_proj_c = wpc_ref[...]                            # (3*IS, HW)
        wgg_s = wggs_ref[...]                              # (IS, 2*HW)
        wgg_c = wggc_ref[...]                              # (IC, 2*C)
        wgg_s_in, wgg_s_out = wgg_s[:, 0:HW], wgg_s[:, HW:2 * HW]
        wgg_c_in, wgg_c_out = wgg_c[:, 0:C], wgg_c[:, C:2 * C]

        bias_s = bias_s_ref[...]                           # (max(3IC,..), 4)
        b_proj_s = bias_s[0:3 * IC, 0:1]                   # (3*IC, 1) column
        bgg_s = bias_s[0:IS, 1:2]                          # (IS, 1)
        bs1 = bias_s[0:NS1, 2:3]                           # (NS1, 1)
        bs2 = bias_s[0:1, 3:4]                             # (1, 1)

        bias_c = bias_c_ref[...]                           # (4, max(3IS,..))
        b_proj_c = bias_c[0:1, 0:3 * IS]                   # (1, 3*IS) row
        bgg_c = bias_c[1:2, 0:IC]                          # (1, IC)
        bc1 = bias_c[2:3, 0:NC1]                           # (1, NC1)
        bc2 = bias_c[3:4, 0:1]                             # (1, 1)

        sw = sw_ref[...]                                   # small-weight slab
        ws1 = sw[0:NS1, 0:1 + IS]                          # (NS1, 1+IS)
        ws2 = sw[NS1:NS1 + 1, 0:NS1]                       # (1, NS1)
        wc1 = sw[NS1 + 1:NS1 + 1 + NC1, 0:1 + IC]          # (NC1, 1+IC)
        wc2 = sw[NS1 + 1 + NC1:NS1 + 2 + NC1, 0:NC1]       # (1, NC1)

        # ------------------------- spatial attention -------------------------
        # fused theta/phi/gx projection: one (3*IC, C) x (C, B*HW) matmul
        proj_s = jnp.maximum(_dot(w_proj_s, X, NN) + b_proj_s, 0.0)  # (3*IC, L)
        theta_s = proj_s[0:IC, :]                          # (IC, L)
        phi_s = proj_s[IC:2 * IC, :]                       # (IC, L)
        g_xs = jnp.mean(proj_s[2 * IC:3 * IC, :], axis=0, keepdims=True)  # (1, L)

        joint = []
        for b in range(B):                                 # B is tiny -> unrolled
            sl = slice(b * HW, (b + 1) * HW)
            th = theta_s[:, sl]                            # (IC, HW)
            ph = phi_s[:, sl]                              # (IC, HW)
            # Gs = th^T @ ph is rank-IC; fold gg_spatial through it without
            # materializing the (HW, HW) Gram matrix:
            #   wgg_in  @ Gs^T = (wgg_in  @ ph^T) @ th
            #   wgg_out @ Gs   = (wgg_out @ th^T) @ ph
            f_in = _dot(wgg_s_in, ph, NT)                  # (IS, IC)
            f_out = _dot(wgg_s_out, th, NT)                # (IS, IC)
            t_in = _dot(f_in, th, NN)                      # (IS, HW)
            t_out = _dot(f_out, ph, NN)                    # (IS, HW)
            joint.append(jnp.maximum(t_in + t_out + bgg_s, 0.0))
        Gs_joint = jnp.concatenate(joint, axis=1)          # (IS, L)

        # W_spatial([g_xs ; Gs_joint]) with g_xs folded in (no concat needed)
        h1 = jnp.maximum(
            _small_linear(ws1[:, 1:1 + IS], bs1, Gs_joint)
            + ws1[:, 0][:, None] * g_xs, 0.0)              # (NS1, L)
        W_ys = _small_linear(ws2, bs2, h1)                 # (1, L)
        x1 = jax.nn.sigmoid(W_ys) * X                      # (C, L) lane-dense gate

        # ---------- channel attention (C on sublanes, no transposes) ----------
        outs = []
        for b in range(B):
            sl = slice(b * HW, (b + 1) * HW)
            x1b = x1[:, sl]                                # (C, HW)
            # fused theta/phi/gx channel projection, transposed orientation
            projT = jnp.maximum(_dot(x1b, w_proj_c, NT) + b_proj_c, 0.0)  # (C, 3*IS)
            thetaT = projT[:, 0:IS]                        # (C, IS)
            phiT = projT[:, IS:2 * IS]                     # (C, IS)
            g_xc = jnp.mean(projT[:, 2 * IS:3 * IS], axis=1, keepdims=True)  # (C, 1)
            # Gc = thetaT @ phiT^T is rank-IS; fold gg_channel through it:
            #   (wgg_in  @ Gc^T)^T = thetaT @ (wgg_in  @ phiT)^T
            #   (wgg_out @ Gc  )^T = phiT   @ (wgg_out @ thetaT)^T
            m_in = _dot(wgg_c_in, phiT, NN)                # (IC, IS)
            m_out = _dot(wgg_c_out, thetaT, NN)            # (IC, IS)
            t_in = _dot(thetaT, m_in, NT)                  # (C, IC)
            t_out = _dot(phiT, m_out, NT)                  # (C, IC)
            jointT = jnp.maximum(t_in + t_out + bgg_c, 0.0)  # (C, IC)
            # W_channel([g_xc ; jointT]) with g_xc folded in (no concat needed)
            h1c = jnp.maximum(
                _small_linear_t(jointT, wc1[:, 1:1 + IC], bc1)
                + g_xc * wc1[:, 0][None, :], 0.0)          # (C, NC1)
            W_yc = _small_linear_t(h1c, wc2, bc2)          # (C, 1) gate column
            outs.append(jax.nn.sigmoid(W_yc) * x1b)        # (C, HW)

        # single lane-dense (C, B*HW) store
        o_ref[...] = jnp.concatenate(outs, axis=1).astype(o_ref.dtype)

    return kernel


# ----------------------------------------------------------------------------
# Parameter packing: 24 arrays -> 7 slabs (fewer input DMAs, fused projections).
# ----------------------------------------------------------------------------
def pack_params(params, C, HW, IC, IS, NS1, NC1):
    (wth_s, bth_s, wph_s, bph_s, wgg_s, bgg_s, wgx_s, bgx_s,
     ws1, bs1, ws2, bs2,
     wth_c, bth_c, wph_c, bph_c, wgg_c, bgg_c, wgx_c, bgx_c,
     wc1, bc1, wc2, bc2) = params
    f32 = jnp.float32

    w_proj_s = jnp.concatenate([wth_s, wph_s, wgx_s], axis=0)   # (3*IC, C)
    w_proj_c = jnp.concatenate([wth_c, wph_c, wgx_c], axis=0)   # (3*IS, HW)

    # spatial-side biases stored as columns of one slab
    r_s = max(3 * IC, IS, NS1, 1)
    bias_s = jnp.zeros((r_s, 4), f32)
    bias_s = bias_s.at[:3 * IC, 0].set(
        jnp.concatenate([bth_s, bph_s, bgx_s], axis=0)[:, 0])
    bias_s = bias_s.at[:IS, 1].set(bgg_s[:, 0])
    bias_s = bias_s.at[:NS1, 2].set(bs1[:, 0])
    bias_s = bias_s.at[:1, 3].set(bs2[:, 0])

    # channel-side biases stored as rows (channel branch runs transposed)
    r_c = max(3 * IS, IC, NC1, 1)
    bias_c = jnp.zeros((4, r_c), f32)
    bias_c = bias_c.at[0, :3 * IS].set(
        jnp.concatenate([bth_c, bph_c, bgx_c], axis=0)[:, 0])
    bias_c = bias_c.at[1, :IC].set(bgg_c[:, 0])
    bias_c = bias_c.at[2, :NC1].set(bc1[:, 0])
    bias_c = bias_c.at[3, :1].set(bc2[:, 0])

    # tiny W_spatial / W_channel weights packed row-wise into one slab
    n_cols = max(1 + IS, 1 + IC, NS1, NC1)
    sw = jnp.zeros((NS1 + NC1 + 2, n_cols), f32)
    sw = sw.at[0:NS1, 0:1 + IS].set(ws1)
    sw = sw.at[NS1:NS1 + 1, 0:NS1].set(ws2)
    sw = sw.at[NS1 + 1:NS1 + 1 + NC1, 0:1 + IC].set(wc1)
    sw = sw.at[NS1 + 1 + NC1:NS1 + 2 + NC1, 0:NC1].set(wc2)

    return w_proj_s, wgg_s, w_proj_c, wgg_c, sw, bias_s, bias_c


def rga_forward(x, params, cha_ratio=8, spa_ratio=8, down_ratio=8):
    B, C, H, W = x.shape
    HW = H * W
    IC = C // cha_ratio
    IS = HW // spa_ratio
    NS1 = (1 + IS) // down_ratio
    NC1 = (1 + IC) // down_ratio
    L = B * HW

    packed = pack_params(params, C, HW, IC, IS, NS1, NC1)

    # lane-dense layout: fold batch into the lane axis -> (C, B*HW)
    x_flat = jnp.transpose(x.reshape(B, C, HW), (1, 0, 2)).reshape(C, L)

    kernel = make_rga_kernel(B, C, HW, IC, IS, NS1, NC1)
    vmem_spec = pl.BlockSpec(memory_space=pltpu.MemorySpace.VMEM)
    out_flat = pl.pallas_call(
        kernel,
        out_shape=jax.ShapeDtypeStruct((C, L), x.dtype),
        in_specs=[vmem_spec] * (1 + len(packed)),
        out_specs=vmem_spec,
    )(x_flat, *packed)

    return jnp.transpose(out_flat.reshape(C, B, HW), (1, 0, 2)).reshape(B, C, H, W)


# ----------------------------------------------------------------------------
# Pure-JAX reference in the "natural" (PyTorch-like) orientation.
# ----------------------------------------------------------------------------
def rga_reference(x, params):
    (wth_s, bth_s, wph_s, bph_s, wgg_s, bgg_s, wgx_s, bgx_s,
     ws1, bs1, ws2, bs2,
     wth_c, bth_c, wph_c, bph_c, wgg_c, bgg_c, wgx_c, bgx_c,
     wc1, bc1, wc2, bc2) = params
    B, C, H, W = x.shape
    HW = H * W

    def lin_relu(Wm, b, M):
        return jnp.maximum(Wm @ M + b, 0.0)

    def one(Xb):                                           # Xb: (C, HW)
        theta = lin_relu(wth_s, bth_s, Xb)                 # (IC, HW)
        phi = lin_relu(wph_s, bph_s, Xb)                   # (IC, HW)
        Gs = theta.T @ phi                                 # (HW, HW)
        Gs_joint = jnp.maximum(
            wgg_s[:, :HW] @ Gs.T + wgg_s[:, HW:] @ Gs + bgg_s, 0.0)
        g_xs = jnp.mean(lin_relu(wgx_s, bgx_s, Xb), axis=0, keepdims=True)
        ys = jnp.concatenate([g_xs, Gs_joint], axis=0)
        h1 = jnp.maximum(ws1 @ ys + bs1, 0.0)
        W_ys = ws2 @ h1 + bs2
        x1 = jax.nn.sigmoid(W_ys) * Xb

        Xt = x1.T                                          # (HW, C)
        theta_c = lin_relu(wth_c, bth_c, Xt)               # (IS, C)
        phi_c = lin_relu(wph_c, bph_c, Xt)                 # (IS, C)
        Gc = theta_c.T @ phi_c                             # (C, C)
        Gc_joint = jnp.maximum(
            wgg_c[:, :C] @ Gc.T + wgg_c[:, C:] @ Gc + bgg_c, 0.0)
        g_xc = jnp.mean(lin_relu(wgx_c, bgx_c, Xt), axis=0, keepdims=True)
        yc = jnp.concatenate([g_xc, Gc_joint], axis=0)
        h1c = jnp.maximum(wc1 @ yc + bc1, 0.0)
        W_yc = wc2 @ h1c + bc2                             # (1, C)
        return jax.nn.sigmoid(W_yc).T * x1                 # (C, HW)

    return jax.vmap(one)(x.reshape(B, C, HW)).reshape(B, C, H, W)


# ----------------------------------------------------------------------------
# Deterministic synthetic parameters (Conv 1x1 + BN(eval) folded together).
# ----------------------------------------------------------------------------
def make_conv_bn(key, out_c, in_c):
    k1, k2, k3, k4, k5 = jax.random.split(key, 5)
    Wc = 0.1 * jax.random.normal(k1, (out_c, in_c), jnp.float32)
    gamma = 1.0 + 0.1 * jax.random.normal(k2, (out_c,), jnp.float32)
    beta = 0.1 * jax.random.normal(k3, (out_c,), jnp.float32)
    mean = 0.1 * jax.random.normal(k4, (out_c,), jnp.float32)
    var = 0.5 + 0.5 * jax.random.uniform(k5, (out_c,), jnp.float32)
    eps = 1e-5
    scale = gamma / jnp.sqrt(var + eps)
    Wf = Wc * scale[:, None]
    bf = (beta - scale * mean)[:, None]        # (out_c, 1)
    return Wf, bf


def init_params(key, C, HW, cha_ratio=8, spa_ratio=8, down_ratio=8):
    IC = C // cha_ratio
    IS = HW // spa_ratio
    ns1 = (1 + IS) // down_ratio
    nc1 = (1 + IC) // down_ratio
    ks = jax.random.split(key, 12)
    wth_s, bth_s = make_conv_bn(ks[0], IC, C)          # theta_spatial
    wph_s, bph_s = make_conv_bn(ks[1], IC, C)          # phi_spatial
    wgg_s, bgg_s = make_conv_bn(ks[2], IS, 2 * HW)     # gg_spatial
    wgx_s, bgx_s = make_conv_bn(ks[3], IC, C)          # gx_spatial
    ws1, bs1 = make_conv_bn(ks[4], ns1, 1 + IS)        # W_spatial[0:3]
    ws2, bs2 = make_conv_bn(ks[5], 1, ns1)             # W_spatial[3:5]
    wth_c, bth_c = make_conv_bn(ks[6], IS, HW)         # theta_channel
    wph_c, bph_c = make_conv_bn(ks[7], IS, HW)         # phi_channel
    wgg_c, bgg_c = make_conv_bn(ks[8], IC, 2 * C)      # gg_channel
    wgx_c, bgx_c = make_conv_bn(ks[9], IS, HW)         # gx_channel
    wc1, bc1 = make_conv_bn(ks[10], nc1, 1 + IC)       # W_channel[0:3]
    wc2, bc2 = make_conv_bn(ks[11], 1, nc1)            # W_channel[3:5]
    return (wth_s, bth_s, wph_s, bph_s, wgg_s, bgg_s, wgx_s, bgx_s,
            ws1, bs1, ws2, bs2,
            wth_c, bth_c, wph_c, bph_c, wgg_c, bgg_c, wgx_c, bgx_c,
            wc1, bc1, wc2, bc2)


if __name__ == "__main__":
    # Shapes consistent with RGA_Module constraints:
    #   inter_channel = C//8 >= 1, (1+C//8)//8 >= 1  -> C = 64
    #   inter_spatial = HW//8,   (1+HW//8)//8 >= 1   -> H = W = 8 (HW = 64)
    B, C, H, W = 2, 64, 8, 8
    key = jax.random.PRNGKey(0)
    kx, kp = jax.random.split(key)
    x = jax.random.normal(kx, (B, C, H, W), jnp.float32)
    params = init_params(kp, C, H * W)

    out = jax.block_until_ready(rga_forward(x, params))
    assert out.shape == (B, C, H, W)

    ref = jax.block_until_ready(rga_reference(x, params))
    max_err = float(jnp.max(jnp.abs(out - ref)))
    assert jnp.allclose(out, ref, atol=2e-3, rtol=2e-3), max_err

    print("KERNEL_OK")
</pallas_src>

<mosaic_0001>
module attributes {stable_mosaic.version = 11 : i64} {
  func.func @kernel(%arg0: memref<64x128xf32, #tpu.memory_space<vmem>>, %arg1: memref<24x64xf32, #tpu.memory_space<vmem>>, %arg2: memref<8x128xf32, #tpu.memory_space<vmem>>, %arg3: memref<24x64xf32, #tpu.memory_space<vmem>>, %arg4: memref<8x128xf32, #tpu.memory_space<vmem>>, %arg5: memref<4x9xf32, #tpu.memory_space<vmem>>, %arg6: memref<24x4xf32, #tpu.memory_space<vmem>>, %arg7: memref<4x24xf32, #tpu.memory_space<vmem>>, %arg8: memref<64x128xf32, #tpu.memory_space<vmem>>) attributes {dimension_semantics = [], scalar_prefetch = 0 : i64, scratch_operands = 0 : i64, tpu.core_type = #tpu.core_type<tc>} {
    %c0 = arith.constant 0 : index
    %c0_0 = arith.constant 0 : index
    %0 = vector.load %arg0[%c0, %c0_0] : memref<64x128xf32, #tpu.memory_space<vmem>>, vector<64x128xf32>
    %c0_1 = arith.constant 0 : index
    %c0_2 = arith.constant 0 : index
    %1 = vector.load %arg1[%c0_1, %c0_2] : memref<24x64xf32, #tpu.memory_space<vmem>>, vector<24x64xf32>
    %c0_3 = arith.constant 0 : index
    %c0_4 = arith.constant 0 : index
    %2 = vector.load %arg3[%c0_3, %c0_4] : memref<24x64xf32, #tpu.memory_space<vmem>>, vector<24x64xf32>
    %c0_5 = arith.constant 0 : index
    %c0_6 = arith.constant 0 : index
    %3 = vector.load %arg2[%c0_5, %c0_6] : memref<8x128xf32, #tpu.memory_space<vmem>>, vector<8x128xf32>
    %c0_7 = arith.constant 0 : index
    %c0_8 = arith.constant 0 : index
    %4 = vector.load %arg4[%c0_7, %c0_8] : memref<8x128xf32, #tpu.memory_space<vmem>>, vector<8x128xf32>
    %5 = vector.extract_strided_slice %3 {offsets = [0, 0], sizes = [8, 64], strides = [1, 1]} : vector<8x128xf32> to vector<8x64xf32>
    %6 = vector.extract_strided_slice %3 {offsets = [0, 64], sizes = [8, 64], strides = [1, 1]} : vector<8x128xf32> to vector<8x64xf32>
    %7 = vector.extract_strided_slice %4 {offsets = [0, 0], sizes = [8, 64], strides = [1, 1]} : vector<8x128xf32> to vector<8x64xf32>
    %8 = vector.extract_strided_slice %4 {offsets = [0, 64], sizes = [8, 64], strides = [1, 1]} : vector<8x128xf32> to vector<8x64xf32>
    %c0_9 = arith.constant 0 : index
    %c0_10 = arith.constant 0 : index
    %9 = vector.load %arg6[%c0_9, %c0_10] : memref<24x4xf32, #tpu.memory_space<vmem>>, vector<24x4xf32>
    %10 = vector.extract_strided_slice %9 {offsets = [0, 0], sizes = [24, 1], strides = [1, 1]} : vector<24x4xf32> to vector<24x1xf32>
    %11 = vector.extract_strided_slice %9 {offsets = [0, 1], sizes = [8, 1], strides = [1, 1]} : vector<24x4xf32> to vector<8x1xf32>
    %12 = vector.extract_strided_slice %9 {offsets = [0, 2], sizes = [1, 1], strides = [1, 1]} : vector<24x4xf32> to vector<1x1xf32>
    %13 = vector.extract_strided_slice %9 {offsets = [0, 3], sizes = [1, 1], strides = [1, 1]} : vector<24x4xf32> to vector<1x1xf32>
    %c0_11 = arith.constant 0 : index
    %c0_12 = arith.constant 0 : index
    %14 = vector.load %arg7[%c0_11, %c0_12] : memref<4x24xf32, #tpu.memory_space<vmem>>, vector<4x24xf32>
    %15 = vector.extract_strided_slice %14 {offsets = [0, 0], sizes = [1, 24], strides = [1, 1]} : vector<4x24xf32> to vector<1x24xf32>
    %16 = vector.extract_strided_slice %14 {offsets = [1, 0], sizes = [1, 8], strides = [1, 1]} : vector<4x24xf32> to vector<1x8xf32>
    %17 = vector.extract_strided_slice %14 {offsets = [2, 0], sizes = [1, 1], strides = [1, 1]} : vector<4x24xf32> to vector<1x1xf32>
    %18 = vector.extract_strided_slice %14 {offsets = [3, 0], sizes = [1, 1], strides = [1, 1]} : vector<4x24xf32> to vector<1x1xf32>
    %c0_13 = arith.constant 0 : index
    %c0_14 = arith.constant 0 : index
    %19 = vector.load %arg5[%c0_13, %c0_14] : memref<4x9xf32, #tpu.memory_space<vmem>>, vector<4x9xf32>
    %20 = vector.extract_strided_slice %19 {offsets = [0, 0], sizes = [1, 9], strides = [1, 1]} : vector<4x9xf32> to vector<1x9xf32>
    %21 = vector.extract_strided_slice %19 {offsets = [1, 0], sizes = [1, 1], strides = [1, 1]} : vector<4x9xf32> to vector<1x1xf32>
    %22 = vector.extract_strided_slice %19 {offsets = [2, 0], sizes = [1, 9], strides = [1, 1]} : vector<4x9xf32> to vector<1x9xf32>
    %23 = vector.extract_strided_slice %19 {offsets = [3, 0], sizes = [1, 1], strides = [1, 1]} : vector<4x9xf32> to vector<1x1xf32>
    %cst = arith.constant dense<0.000000e+00> : vector<24x128xf32>
    %24 = tpu.matmul %1, %0, %cst {dimension_numbers = #tpu.dot_dimension_numbers<[1], [0], [0], [1], [0, 0, 1, 1], [], []>} : vector<24x64xf32>, vector<64x128xf32>, vector<24x128xf32> -> vector<24x128xf32>
    %25 = vector.broadcast %10 : vector<24x1xf32> to vector<24x128xf32>
    %26 = arith.addf %24, %25 : vector<24x128xf32>
    %cst_15 = arith.constant 0.000000e+00 : f32
    %27 = vector.broadcast %cst_15 : f32 to vector<24x128xf32>
    %28 = arith.maximumf %26, %27 : vector<24x128xf32>
    %29 = vector.extract_strided_slice %28 {offsets = [0, 0], sizes = [8, 128], strides = [1, 1]} : vector<24x128xf32> to vector<8x128xf32>
    %30 = vector.extract_strided_slice %28 {offsets = [8, 0], sizes = [8, 128], strides = [1, 1]} : vector<24x128xf32> to vector<8x128xf32>
    %31 = vector.extract_strided_slice %28 {offsets = [16, 0], sizes = [8, 128], strides = [1, 1]} : vector<24x128xf32> to vector<8x128xf32>
    %cst_16 = arith.constant dense<0.000000e+00> : vector<128xf32>
    %32 = vector.multi_reduction <add>, %31, %cst_16 [0] : vector<8x128xf32> to vector<128xf32>
    %33 = vector.shape_cast %32 : vector<128xf32> to vector<1x128xf32>
    %cst_17 = arith.constant 8.000000e+00 : f32
    %34 = vector.broadcast %cst_17 : f32 to vector<1x128xf32>
    %35 = arith.divf %33, %34 : vector<1x128xf32>
    %36 = vector.extract_strided_slice %29 {offsets = [0, 0], sizes = [8, 64], strides = [1, 1]} : vector<8x128xf32> to vector<8x64xf32>
    %37 = vector.extract_strided_slice %30 {offsets = [0, 0], sizes = [8, 64], strides = [1, 1]} : vector<8x128xf32> to vector<8x64xf32>
    %cst_18 = arith.constant dense<0.000000e+00> : vector<8x8xf32>
    %38 = tpu.matmul %5, %37, %cst_18 {dimension_numbers = #tpu.dot_dimension_numbers<[1], [1], [0], [0], [0, 0, 1, 0], [], []>} : vector<8x64xf32>, vector<8x64xf32>, vector<8x8xf32> -> vector<8x8xf32>
    %cst_19 = arith.constant dense<0.000000e+00> : vector<8x8xf32>
    %39 = tpu.matmul %6, %36, %cst_19 {dimension_numbers = #tpu.dot_dimension_numbers<[1], [1], [0], [0], [0, 0, 1, 0], [], []>} : vector<8x64xf32>, vector<8x64xf32>, vector<8x8xf32> -> vector<8x8xf32>
    %cst_20 = arith.constant dense<0.000000e+00> : vector<8x64xf32>
    %40 = tpu.matmul %38, %36, %cst_20 {dimension_numbers = #tpu.dot_dimension_numbers<[1], [0], [0], [1], [0, 0, 1, 1], [], []>} : vector<8x8xf32>, vector<8x64xf32>, vector<8x64xf32> -> vector<8x64xf32>
    %cst_21 = arith.constant dense<0.000000e+00> : vector<8x64xf32>
    %41 = tpu.matmul %39, %37, %cst_21 {dimension_numbers = #tpu.dot_dimension_numbers<[1], [0], [0], [1], [0, 0, 1, 1], [], []>} : vector<8x8xf32>, vector<8x64xf32>, vector<8x64xf32> -> vector<8x64xf32>
    %42 = arith.addf %40, %41 : vector<8x64xf32>
    %43 = vector.broadcast %11 : vector<8x1xf32> to vector<8x64xf32>
    %44 = arith.addf %42, %43 : vector<8x64xf32>
    %cst_22 = arith.constant 0.000000e+00 : f32
    %45 = vector.broadcast %cst_22 : f32 to vector<8x64xf32>
    %46 = arith.maximumf %44, %45 : vector<8x64xf32>
    %47 = vector.extract_strided_slice %29 {offsets = [0, 64], sizes = [8, 64], strides = [1, 1]} : vector<8x128xf32> to vector<8x64xf32>
    %48 = vector.extract_strided_slice %30 {offsets = [0, 64], sizes = [8, 64], strides = [1, 1]} : vector<8x128xf32> to vector<8x64xf32>
    %cst_23 = arith.constant dense<0.000000e+00> : vector<8x8xf32>
    %49 = tpu.matmul %5, %48, %cst_23 {dimension_numbers = #tpu.dot_dimension_numbers<[1], [1], [0], [0], [0, 0, 1, 0], [], []>} : vector<8x64xf32>, vector<8x64xf32>, vector<8x8xf32> -> vector<8x8xf32>
    %cst_24 = arith.constant dense<0.000000e+00> : vector<8x8xf32>
    %50 = tpu.matmul %6, %47, %cst_24 {dimension_numbers = #tpu.dot_dimension_numbers<[1], [1], [0], [0], [0, 0, 1, 0], [], []>} : vector<8x64xf32>, vector<8x64xf32>, vector<8x8xf32> -> vector<8x8xf32>
    %cst_25 = arith.constant dense<0.000000e+00> : vector<8x64xf32>
    %51 = tpu.matmul %49, %47, %cst_25 {dimension_numbers = #tpu.dot_dimension_numbers<[1], [0], [0], [1], [0, 0, 1, 1], [], []>} : vector<8x8xf32>, vector<8x64xf32>, vector<8x64xf32> -> vector<8x64xf32>
    %cst_26 = arith.constant dense<0.000000e+00> : vector<8x64xf32>
    %52 = tpu.matmul %50, %48, %cst_26 {dimension_numbers = #tpu.dot_dimension_numbers<[1], [0], [0], [1], [0, 0, 1, 1], [], []>} : vector<8x8xf32>, vector<8x64xf32>, vector<8x64xf32> -> vector<8x64xf32>
    %53 = arith.addf %51, %52 : vector<8x64xf32>
    %54 = vector.broadcast %11 : vector<8x1xf32> to vector<8x64xf32>
    %55 = arith.addf %53, %54 : vector<8x64xf32>
    %cst_27 = arith.constant 0.000000e+00 : f32
    %56 = vector.broadcast %cst_27 : f32 to vector<8x64xf32>
    %57 = arith.maximumf %55, %56 : vector<8x64xf32>
    %58 = tpu.concatenate %46, %57 in 1 : vector<8x64xf32>, vector<8x64xf32> -> vector<8x128xf32>
    %59 = vector.extract_strided_slice %20 {offsets = [0, 1], sizes = [1, 8], strides = [1, 1]} : vector<1x9xf32> to vector<1x8xf32>
    %60 = vector.shape_cast %59 : vector<1x8xf32> to vector<8xf32>
    %61 = vector.shape_cast %60 : vector<8xf32> to vector<8x1xf32>
    %62 = vector.broadcast %61 : vector<8x1xf32> to vector<8x128xf32>
    %63 = arith.mulf %62, %58 : vector<8x128xf32>
    %cst_28 = arith.constant dense<0.000000e+00> : vector<128xf32>
    %64 = vector.multi_reduction <add>, %63, %cst_28 [0] : vector<8x128xf32> to vector<128xf32>
    %65 = vector.shape_cast %64 : vector<128xf32> to vector<1x128xf32>
    %66 = vector.broadcast %12 : vector<1x1xf32> to vector<1x128xf32>
    %67 = arith.addf %65, %66 : vector<1x128xf32>
    %68 = vector.extract_strided_slice %20 {offsets = [0, 0], sizes = [1, 1], strides = [1, 1]} : vector<1x9xf32> to vector<1x1xf32>
    %69 = vector.shape_cast %68 : vector<1x1xf32> to vector<1xf32>
    %70 = vector.shape_cast %69 : vector<1xf32> to vector<1x1xf32>
    %71 = vector.broadcast %70 : vector<1x1xf32> to vector<1x128xf32>
    %72 = arith.mulf %71, %35 : vector<1x128xf32>
    %73 = arith.addf %67, %72 : vector<1x128xf32>
    %cst_29 = arith.constant 0.000000e+00 : f32
    %74 = vector.broadcast %cst_29 : f32 to vector<1x128xf32>
    %75 = arith.maximumf %73, %74 : vector<1x128xf32>
    %76 = vector.shape_cast %21 : vector<1x1xf32> to vector<1xf32>
    %77 = vector.shape_cast %76 : vector<1xf32> to vector<1x1xf32>
    %78 = vector.broadcast %77 : vector<1x1xf32> to vector<1x128xf32>
    %79 = arith.mulf %78, %75 : vector<1x128xf32>
    %cst_30 = arith.constant dense<0.000000e+00> : vector<128xf32>
    %80 = vector.multi_reduction <add>, %79, %cst_30 [0] : vector<1x128xf32> to vector<128xf32>
    %81 = vector.shape_cast %80 : vector<128xf32> to vector<1x128xf32>
    %82 = vector.broadcast %13 : vector<1x1xf32> to vector<1x128xf32>
    %83 = arith.addf %81, %82 : vector<1x128xf32>
    %84 = arith.negf %83 : vector<1x128xf32>
    %85 = math.exp %84 : vector<1x128xf32>
    %cst_31 = arith.constant 1.000000e+00 : f32
    %86 = vector.broadcast %cst_31 : f32 to vector<1x128xf32>
    %87 = arith.addf %86, %85 : vector<1x128xf32>
    %88 = arith.divf %86, %87 : vector<1x128xf32>
    %89 = vector.broadcast %88 : vector<1x128xf32> to vector<64x128xf32>
    %90 = arith.mulf %89, %0 : vector<64x128xf32>
    %91 = vector.extract_strided_slice %90 {offsets = [0, 0], sizes = [64, 64], strides = [1, 1]} : vector<64x128xf32> to vector<64x64xf32>
    %cst_32 = arith.constant dense<0.000000e+00> : vector<64x24xf32>
    %92 = tpu.matmul %91, %2, %cst_32 {dimension_numbers = #tpu.dot_dimension_numbers<[1], [1], [0], [0], [0, 0, 1, 0], [], []>} : vector<64x64xf32>, vector<24x64xf32>, vector<64x24xf32> -> vector<64x24xf32>
    %93 = vector.broadcast %15 : vector<1x24xf32> to vector<64x24xf32>
    %94 = arith.addf %92, %93 : vector<64x24xf32>
    %cst_33 = arith.constant 0.000000e+00 : f32
    %95 = vector.broadcast %cst_33 : f32 to vector<64x24xf32>
    %96 = arith.maximumf %94, %95 : vector<64x24xf32>
    %97 = vector.extract_strided_slice %96 {offsets = [0, 0], sizes = [64, 8], strides = [1, 1]} : vector<64x24xf32> to vector<64x8xf32>
    %98 = vector.extract_strided_slice %96 {offsets = [0, 8], sizes = [64, 8], strides = [1, 1]} : vector<64x24xf32> to vector<64x8xf32>
    %99 = vector.extract_strided_slice %96 {offsets = [0, 16], sizes = [64, 8], strides = [1, 1]} : vector<64x24xf32> to vector<64x8xf32>
    %cst_34 = arith.constant dense<0.000000e+00> : vector<64xf32>
    %100 = vector.multi_reduction <add>, %99, %cst_34 [1] : vector<64x8xf32> to vector<64xf32>
    %101 = vector.shape_cast %100 : vector<64xf32> to vector<64x1xf32>
    %cst_35 = arith.constant 8.000000e+00 : f32
    %102 = vector.broadcast %cst_35 : f32 to vector<64x1xf32>
    %103 = arith.divf %101, %102 : vector<64x1xf32>
    %cst_36 = arith.constant dense<0.000000e+00> : vector<8x8xf32>
    %104 = tpu.matmul %7, %98, %cst_36 {dimension_numbers = #tpu.dot_dimension_numbers<[1], [0], [0], [1], [0, 0, 1, 1], [], []>} : vector<8x64xf32>, vector<64x8xf32>, vector<8x8xf32> -> vector<8x8xf32>
    %cst_37 = arith.constant dense<0.000000e+00> : vector<8x8xf32>
    %105 = tpu.matmul %8, %97, %cst_37 {dimension_numbers = #tpu.dot_dimension_numbers<[1], [0], [0], [1], [0, 0, 1, 1], [], []>} : vector<8x64xf32>, vector<64x8xf32>, vector<8x8xf32> -> vector<8x8xf32>
    %cst_38 = arith.constant dense<0.000000e+00> : vector<64x8xf32>
    %106 = tpu.matmul %97, %104, %cst_38 {dimension_numbers = #tpu.dot_dimension_numbers<[1], [1], [0], [0], [0, 0, 1, 0], [], []>} : vector<64x8xf32>, vector<8x8xf32>, vector<64x8xf32> -> vector<64x8xf32>
    %cst_39 = arith.constant dense<0.000000e+00> : vector<64x8xf32>
    %107 = tpu.matmul %98, %105, %cst_39 {dimension_numbers = #tpu.dot_dimension_numbers<[1], [1], [0], [0], [0, 0, 1, 0], [], []>} : vector<64x8xf32>, vector<8x8xf32>, vector<64x8xf32> -> vector<64x8xf32>
    %108 = arith.addf %106, %107 : vector<64x8xf32>
    %109 = vector.broadcast %16 : vector<1x8xf32> to vector<64x8xf32>
    %110 = arith.addf %108, %109 : vector<64x8xf32>
    %cst_40 = arith.constant 0.000000e+00 : f32
    %111 = vector.broadcast %cst_40 : f32 to vector<64x8xf32>
    %112 = arith.maximumf %110, %111 : vector<64x8xf32>
    %113 = vector.extract_strided_slice %22 {offsets = [0, 1], sizes = [1, 8], strides = [1, 1]} : vector<1x9xf32> to vector<1x8xf32>
    %114 = vector.shape_cast %113 : vector<1x8xf32> to vector<8xf32>
    %115 = vector.shape_cast %114 : vector<8xf32> to vector<1x8xf32>
    %116 = vector.broadcast %115 : vector<1x8xf32> to vector<64x8xf32>
    %117 = arith.mulf %112, %116 : vector<64x8xf32>
    %cst_41 = arith.constant dense<0.000000e+00> : vector<64xf32>
    %118 = vector.multi_reduction <add>, %117, %cst_41 [1] : vector<64x8xf32> to vector<64xf32>
    %119 = vector.shape_cast %118 : vector<64xf32> to vector<64x1xf32>
    %120 = vector.broadcast %17 : vector<1x1xf32> to vector<64x1xf32>
    %121 = arith.addf %119, %120 : vector<64x1xf32>
    %122 = vector.extract_strided_slice %22 {offsets = [0, 0], sizes = [1, 1], strides = [1, 1]} : vector<1x9xf32> to vector<1x1xf32>
    %123 = vector.shape_cast %122 : vector<1x1xf32> to vector<1xf32>
    %124 = vector.shape_cast %123 : vector<1xf32> to vector<1x1xf32>
    %125 = vector.broadcast %124 : vector<1x1xf32> to vector<64x1xf32>
    %126 = arith.mulf %103, %125 : vector<64x1xf32>
    %127 = arith.addf %121, %126 : vector<64x1xf32>
    %cst_42 = arith.constant 0.000000e+00 : f32
    %128 = vector.broadcast %cst_42 : f32 to vector<64x1xf32>
    %129 = arith.maximumf %127, %128 : vector<64x1xf32>
    %130 = vector.shape_cast %23 : vector<1x1xf32> to vector<1xf32>
    %131 = vector.shape_cast %130 : vector<1xf32> to vector<1x1xf32>
    %132 = vector.broadcast %131 : vector<1x1xf32> to vector<64x1xf32>
    %133 = arith.mulf %129, %132 : vector<64x1xf32>
    %cst_43 = arith.constant dense<0.000000e+00> : vector<64xf32>
    %134 = vector.multi_reduction <add>, %133, %cst_43 [1] : vector<64x1xf32> to vector<64xf32>
    %135 = vector.shape_cast %134 : vector<64xf32> to vector<64x1xf32>
    %136 = vector.broadcast %18 : vector<1x1xf32> to vector<64x1xf32>
    %137 = arith.addf %135, %136 : vector<64x1xf32>
    %138 = arith.negf %137 : vector<64x1xf32>
    %139 = math.exp %138 : vector<64x1xf32>
    %cst_44 = arith.constant 1.000000e+00 : f32
    %140 = vector.broadcast %cst_44 : f32 to vector<64x1xf32>
    %141 = arith.addf %140, %139 : vector<64x1xf32>
    %142 = arith.divf %140, %141 : vector<64x1xf32>
    %143 = vector.broadcast %142 : vector<64x1xf32> to vector<64x64xf32>
    %144 = arith.mulf %143, %91 : vector<64x64xf32>
    %145 = vector.extract_strided_slice %90 {offsets = [0, 64], sizes = [64, 64], strides = [1, 1]} : vector<64x128xf32> to vector<64x64xf32>
    %cst_45 = arith.constant dense<0.000000e+00> : vector<64x24xf32>
    %146 = tpu.matmul %145, %2, %cst_45 {dimension_numbers = #tpu.dot_dimension_numbers<[1], [1], [0], [0], [0, 0, 1, 0], [], []>} : vector<64x64xf32>, vector<24x64xf32>, vector<64x24xf32> -> vector<64x24xf32>
    %147 = vector.broadcast %15 : vector<1x24xf32> to vector<64x24xf32>
    %148 = arith.addf %146, %147 : vector<64x24xf32>
    %cst_46 = arith.constant 0.000000e+00 : f32
    %149 = vector.broadcast %cst_46 : f32 to vector<64x24xf32>
    %150 = arith.maximumf %148, %149 : vector<64x24xf32>
    %151 = vector.extract_strided_slice %150 {offsets = [0, 0], sizes = [64, 8], strides = [1, 1]} : vector<64x24xf32> to vector<64x8xf32>
    %152 = vector.extract_strided_slice %150 {offsets = [0, 8], sizes = [64, 8], strides = [1, 1]} : vector<64x24xf32> to vector<64x8xf32>
    %153 = vector.extract_strided_slice %150 {offsets = [0, 16], sizes = [64, 8], strides = [1, 1]} : vector<64x24xf32> to vector<64x8xf32>
    %cst_47 = arith.constant dense<0.000000e+00> : vector<64xf32>
    %154 = vector.multi_reduction <add>, %153, %cst_47 [1] : vector<64x8xf32> to vector<64xf32>
    %155 = vector.shape_cast %154 : vector<64xf32> to vector<64x1xf32>
    %cst_48 = arith.constant 8.000000e+00 : f32
    %156 = vector.broadcast %cst_48 : f32 to vector<64x1xf32>
    %157 = arith.divf %155, %156 : vector<64x1xf32>
    %cst_49 = arith.constant dense<0.000000e+00> : vector<8x8xf32>
    %158 = tpu.matmul %7, %152, %cst_49 {dimension_numbers = #tpu.dot_dimension_numbers<[1], [0], [0], [1], [0, 0, 1, 1], [], []>} : vector<8x64xf32>, vector<64x8xf32>, vector<8x8xf32> -> vector<8x8xf32>
    %cst_50 = arith.constant dense<0.000000e+00> : vector<8x8xf32>
    %159 = tpu.matmul %8, %151, %cst_50 {dimension_numbers = #tpu.dot_dimension_numbers<[1], [0], [0], [1], [0, 0, 1, 1], [], []>} : vector<8x64xf32>, vector<64x8xf32>, vector<8x8xf32> -> vector<8x8xf32>
    %cst_51 = arith.constant dense<0.000000e+00> : vector<64x8xf32>
    %160 = tpu.matmul %151, %158, %cst_51 {dimension_numbers = #tpu.dot_dimension_numbers<[1], [1], [0], [0], [0, 0, 1, 0], [], []>} : vector<64x8xf32>, vector<8x8xf32>, vector<64x8xf32> -> vector<64x8xf32>
    %cst_52 = arith.constant dense<0.000000e+00> : vector<64x8xf32>
    %161 = tpu.matmul %152, %159, %cst_52 {dimension_numbers = #tpu.dot_dimension_numbers<[1], [1], [0], [0], [0, 0, 1, 0], [], []>} : vector<64x8xf32>, vector<8x8xf32>, vector<64x8xf32> -> vector<64x8xf32>
    %162 = arith.addf %160, %161 : vector<64x8xf32>
    %163 = vector.broadcast %16 : vector<1x8xf32> to vector<64x8xf32>
    %164 = arith.addf %162, %163 : vector<64x8xf32>
    %cst_53 = arith.constant 0.000000e+00 : f32
    %165 = vector.broadcast %cst_53 : f32 to vector<64x8xf32>
    %166 = arith.maximumf %164, %165 : vector<64x8xf32>
    %167 = vector.extract_strided_slice %22 {offsets = [0, 1], sizes = [1, 8], strides = [1, 1]} : vector<1x9xf32> to vector<1x8xf32>
    %168 = vector.shape_cast %167 : vector<1x8xf32> to vector<8xf32>
    %169 = vector.shape_cast %168 : vector<8xf32> to vector<1x8xf32>
    %170 = vector.broadcast %169 : vector<1x8xf32> to vector<64x8xf32>
    %171 = arith.mulf %166, %170 : vector<64x8xf32>
    %cst_54 = arith.constant dense<0.000000e+00> : vector<64xf32>
    %172 = vector.multi_reduction <add>, %171, %cst_54 [1] : vector<64x8xf32> to vector<64xf32>
    %173 = vector.shape_cast %172 : vector<64xf32> to vector<64x1xf32>
    %174 = vector.broadcast %17 : vector<1x1xf32> to vector<64x1xf32>
    %175 = arith.addf %173, %174 : vector<64x1xf32>
    %176 = vector.extract_strided_slice %22 {offsets = [0, 0], sizes = [1, 1], strides = [1, 1]} : vector<1x9xf32> to vector<1x1xf32>
    %177 = vector.shape_cast %176 : vector<1x1xf32> to vector<1xf32>
    %178 = vector.shape_cast %177 : vector<1xf32> to vector<1x1xf32>
    %179 = vector.broadcast %178 : vector<1x1xf32> to vector<64x1xf32>
    %180 = arith.mulf %157, %179 : vector<64x1xf32>
    %181 = arith.addf %175, %180 : vector<64x1xf32>
    %cst_55 = arith.constant 0.000000e+00 : f32
    %182 = vector.broadcast %cst_55 : f32 to vector<64x1xf32>
    %183 = arith.maximumf %181, %182 : vector<64x1xf32>
    %184 = vector.shape_cast %23 : vector<1x1xf32> to vector<1xf32>
    %185 = vector.shape_cast %184 : vector<1xf32> to vector<1x1xf32>
    %186 = vector.broadcast %185 : vector<1x1xf32> to vector<64x1xf32>
    %187 = arith.mulf %183, %186 : vector<64x1xf32>
    %cst_56 = arith.constant dense<0.000000e+00> : vector<64xf32>
    %188 = vector.multi_reduction <add>, %187, %cst_56 [1] : vector<64x1xf32> to vector<64xf32>
    %189 = vector.shape_cast %188 : vector<64xf32> to vector<64x1xf32>
    %190 = vector.broadcast %18 : vector<1x1xf32> to vector<64x1xf32>
    %191 = arith.addf %189, %190 : vector<64x1xf32>
    %192 = arith.negf %191 : vector<64x1xf32>
    %193 = math.exp %192 : vector<64x1xf32>
    %cst_57 = arith.constant 1.000000e+00 : f32
    %194 = vector.broadcast %cst_57 : f32 to vector<64x1xf32>
    %195 = arith.addf %194, %193 : vector<64x1xf32>
    %196 = arith.divf %194, %195 : vector<64x1xf32>
    %197 = vector.broadcast %196 : vector<64x1xf32> to vector<64x64xf32>
    %198 = arith.mulf %197, %145 : vector<64x64xf32>
    %199 = tpu.concatenate %144, %198 in 1 : vector<64x64xf32>, vector<64x64xf32> -> vector<64x128xf32>
    %c0_58 = arith.constant 0 : index
    %c0_59 = arith.constant 0 : index
    %200 = vector.load %arg8[%c0_58, %c0_59] : memref<64x128xf32, #tpu.memory_space<vmem>>, vector<64x128xf32>
    tpu.vector_store %arg8[%c0_58, %c0_59], %199 {strides = array<i32>} : memref<64x128xf32, #tpu.memory_space<vmem>>, vector<64x128xf32>,
    return
  }
}

</mosaic_0001>

<bundles_post_ra>
// kernel: tpu_custom_call.1
= control target key start
LH: loop header
LB: loop body
LE: loop exit
PB: predicated region body
PF: predicated region fallthrough
CT: control target
= control target key end

     0   :  { %13 = vsyncpa [#allocation3], 0  ;;  %s4074_s0 = inlined_call_operand.hbm [shape: f32[64,128], index: 0, kind: input, shape index: {}]   ;;  %s4075_s1 = inlined_call_operand.vmem [shape: f32[24,64], index: 1, kind: input, shape index: {}]   ;;  %s4076_s2 = inlined_call_operand.vmem [shape: f32[8,128], index: 2, kind: input, shape index: {}]   ;;  %s4077_s3 = inlined_call_operand.hbm [shape: f32[24,64], index: 3, kind: input, shape index: {}]   ;;  %s4078_s4 = inlined_call_operand.vmem [shape: f32[8,128], index: 4, kind: input, shape index: {}]   ;;  %s4079_s5 = inlined_call_operand.vmem [shape: f32[4,9], index: 5, kind: input, shape index: {}]   ;;  %s4080_s6 = inlined_call_operand.vmem [shape: f32[24,4], index: 6, kind: input, shape index: {}]   ;;  %s4081_s7 = inlined_call_operand.vmem [shape: f32[4,24], index: 7, kind: input, shape index: {}]   ;;  %s4082_s8 = inlined_call_operand.hbm [shape: f32[64,128], index: 8, kind: output, shape index: {}]  }
   0x1   :  { %14 = vsyncpa [#allocation6], 0 }
   0x2   :  { %15 = vsyncpa [#allocation4], 0  ;;  %s3271_s27 = smov [#allocation2]   ;;  %s3199_s9 = scalar_lea.hbm %s4074_s0, 1024 }
   0x3   :  { %s21_s28 = sshll.u32 %s3271_s27, 4  ;;  %p3200_p0 = scmp.ne.s32.totalorder %s4074_s0, %s3199_s9  ;;  %s22_s28 = int_to_ptr.vmem [resolvable:$true] %s21_s28 }
   0x4   :  { %p3203_p1 = scmp.lt.u32.totalorder %s3199_s9, %s4074_s0 }
   0x6   :  { %p3205_p2 = pnand %p3203_p1, %p3200_p0 }
   0x8   :  { %3208 = shalt.err (!%p3205_p2)
}
   0x9   :  { %s3209_s14 = scalar_lea.vmem %s22_s28, 1024  ;;  %p3214_p4 = scmp.lt.s32.totalorder %s22_s28, %s22_s28 }
   0xa   :  { %p3210_p3 = scmp.ne.s32.totalorder %s22_s28, %s3209_s14  ;;  %p3215_p5 = scmp.lt.s32.totalorder %s3209_s14, %s3209_s14 }
   0xc   :  { %p3216_p6 = por %p3215_p5, %p3214_p4 }
   0xe   :  { %p3217_p7 = pnand %p3216_p6, %p3210_p3 }
  0x10   :  { %3220 = shalt.err (!%p3217_p7)
}
  0x11   :  { %s3272_s15 = smov 128   ;;  %s3273_s16 = smov 8  }
  0x12   :  { %27 = dma.hbm_to_vmem [thread:$0]  %s4074_s0, 1024, %s22_s28, [#allocation3], %s3272_s15, %s3272_s15, %s3273_s16  }
  0x13   :  { %s3274_s19 = smov [#allocation5]   ;;  %s3221_s23 = scalar_lea.hbm %s4077_s3, 384 }
  0x14   :  { %s37_s20 = sshll.u32 %s3274_s19, 4  ;;  %p3222_p8 = scmp.ne.s32.totalorder %s4077_s3, %s3221_s23  ;;  %s38_s20 = int_to_ptr.vmem [resolvable:$true] %s37_s20 }
  0x15   :  { %p3225_p9 = scmp.lt.u32.totalorder %s3221_s23, %s4077_s3 }
  0x17   :  { %p3227_p10 = pnand %p3225_p9, %p3222_p8 }
  0x19   :  { %3230 = shalt.err (!%p3227_p10)
}
  0x1a   :  { %s3231_s29 = scalar_lea.vmem %s38_s20, 384  ;;  %p3236_p12 = scmp.lt.s32.totalorder %s38_s20, %s38_s20 }
  0x1b   :  { %p3232_p11 = scmp.ne.s32.totalorder %s38_s20, %s3231_s29  ;;  %p3237_p13 = scmp.lt.s32.totalorder %s3231_s29, %s3231_s29 }
  0x1d   :  { %p3238_p0 = por %p3237_p13, %p3236_p12 }
  0x1f   :  { %p3239_p1 = pnand %p3238_p0, %p3232_p11 }
  0x21   :  { %3242 = shalt.err (!%p3239_p1)
}
  0x22   :  { %43 = dma.hbm_to_vmem [thread:$0]  %s4077_s3, 384, %s38_s20, [#allocation6], %s3272_s15, %s3272_s15, %s3273_s16  }
  0x23   :  { %3265 = dma.done.wait [#allocation3], 1024  }
  0x24   :  { %3266 = vsyncadd [#allocation3], 4294966272 }
  0x25   :  { %3267 = dma.done.wait [#allocation6], 384  }
  0x26   :  { %3268 = vsyncadd [#allocation6], 4294966912  ;;  %v3275_v0 = vmov 0.0|0.0   ;;  %vm3276_vm0 = vmmov 0   ;;  %v3277_v1 = vmov 0.0   ;;  %v3278_v2 = vmov 0  }
  0x27   :  { %3021 = vmatprep.subr.bf16.mxu0 %v3275_v0  ;;  %2804 = vmatprep.mubr.msk.f32.mxu0 %vm3276_vm0, %v3277_v1  ;;  %v3369_v3 = vld [vmem:[#allocation2] sm:$0xff]  ;;  %v3371_v4 = vld [vmem:[#allocation2 + $0x8] sm:$0xff]  ;;  %v3373_v5 = vld [vmem:[#allocation2 + $0x10] sm:$0xff]  ;;  %s3279_s13 = smov 64   ;;  %vm94_vm1 = vcmask 523264   ;;  %v804_v21 = vlaneseq  ;;  %v3280_v45 = vmov 1  }
  0x28   :  { %3125 = vset.pattern.permute.xlu0 %v3278_v2  ;;  %2813 = vmatprep.subr.mxu1 %v3277_v1  ;;  %v3022_v6 = vpack.c.bf16 %v3371_v4, %v3369_v3  ;;  %v3377_v7 = vld [vmem:[#allocation2 + $0x18] sm:$0xff]  ;;  %v75_v9 = vld [vmem:[%s4080_s6 + $0x8] sm:$0xff]  ;;  %v3385_v10 = vld [vmem:[#allocation2 + $0x20] sm:$0xff]  ;;  %vm348_vm2 = vcmask 64512   ;;  %v3281_v61 = vmov 2   ;;  %s3284_s26 = smov 112  }
  0x29   :  { %2815 = vmatprep.mubr.msk.f32.mxu1 %vm3276_vm0, %v3277_v1  ;;  %v3025_v8 = vpack.c.bf16 %v3377_v7, %v3373_v5  ;;  %v3387_v11 = vld [vmem:[#allocation2 + $0x28] sm:$0xff]  ;;  %86 = vperm.xlu0 %3125, %v75_v9   ;;  %v3392_v12 = vld [vmem:[%s4076_s2] sm:$0xff]  ;;  %v3404_v15 = vld [vmem:[#allocation2 + $0x30] sm:$0xff]  ;;  %v3431_v22 = vshrl.u32 %v804_v21, 7  ;;  %s3285_s27 = smov 127  }
  0x2a   :  { %3023 = vmatpush3.bf16.msra.mxu0 %v3022_v6  ;;  %v3397_v13 = vld [vmem:[%s4080_s6] sm:$0xff]  ;;  %271 = vrot.lane.b32.xlu1 %v3392_v12, %s3279_s13  ;;  %v3028_v14 = vpack.c.bf16 %v3387_v11, %v3385_v10  ;;  %v3406_v16 = vld [vmem:[#allocation2 + $0x38] sm:$0xff]  ;;  %v67_v19 = vld [vmem:[%s4075_s1 + $0x8] sm:$0xff] }
  0x2b   :  { %3024 = vmatprep.subr.bf16.mxu0 %v3275_v0  ;;  %v3031_v17 = vpack.c.bf16 %v3406_v16, %v3404_v15  ;;  %v66_v18 = vld [vmem:[%s4075_s1] sm:$0xff]  ;;  %v68_v20 = vld [vmem:[%s4075_s1 + $0x10] sm:$0xff]  ;;  %v1516_v23 = vsub.s32 2, %v3431_v22  ;;  %v1592_v25 = vsub.s32 3, %v3431_v22  ;;  %v806_v37 = vsub.s32 0, %v3431_v22  ;;  %3126 = vset.pattern.permute.xlu1 %v3280_v45  ;;  %vm3511_vm3 = vmpackc.low %vm94_vm1, %vm94_vm1 }
  0x2c   :  { %v3437_v24 = vld [vmem:[%s4081_s7] sm:$0xf]  ;;  %v76_v38 = vld [vmem:[%s4080_s6 + $0x10] sm:$0xff] }
  0x2d   :  { %81 = vperm.xlu0 %3125, %v3397_v13   ;;  %v3443_v26 = vrot.slane %v3437_v24, %v1516_v23  ;;  %v3448_v27 = vrot.slane %v3437_v24, %v1592_v25  ;;  %v3458_v39 = vld [vmem:[%s4079_s5] sm:$0xf] }
  0x2e   :  { %3026 = vmatpush3.bf16.msra.mxu0 %v3025_v8  ;;  %v807_v42 = vrot.slane %v3458_v39, %v806_v37 }
  0x2f   :  { %3027 = vmatprep.subr.bf16.mxu0 %v3275_v0 }
  0x32   :  { %3029 = vmatpush3.bf16.msra.mxu0 %v3028_v14 }
  0x33   :  { %3030 = vmatprep.subr.bf16.mxu0 %v3275_v0 }
  0x36   :  { %3032 = vmatpush3.bf16.msra.mxu0 %v3031_v17 }
  0x37   :  { %2843 = vmatprep.subr.mxu0 %v3277_v1 }
  0x39   :  { %2805 = vmatmul.mubr.msk.f32.vlgmr.msra.gmra.mrb[0].mxu0 %vm94_vm1, %v66_v18  ;;  %v3282_v18 = vmov 3  }
  0x3a   :  { %2807 = vmatprep.mubr.msk.f32.mxu0 %vm3276_vm0, %v3277_v1 }
  0x3d   :  { %2808 = vmatmul.mubr.msk.f32.gmra.mrb[2].mxu0 %vm94_vm1, %v67_v19  ;;  %v69_v19 = vld [vmem:[#allocation5] sm:$0xff] }
  0x3e   :  { %2810 = vmatprep.mubr.msk.f32.mxu0 %vm3276_vm0, %v3277_v1 }
  0x41   :  { %2811 = vmatmul.mubr.msk.f32.gmra.mrb[4].mxu0 %vm94_vm1, %v68_v20  ;;  %v70_v20 = vld [vmem:[#allocation5 + $0x8] sm:$0xff] }
  0x42   :  { %2845 = vmatprep.mubr.msk.f32.mxu0 %vm3276_vm0, %v3277_v1  ;;  %v3507_v21 = vpack.c.bf16 %v70_v20, %v69_v19 }
  0x9c   :  { %v272_v44 = vpop.permute.xlu1 %271 }
  0xa8   :  { %v87_v28 = vpop.permute.xlu0 %86 }
  0xac   :  { %v82_v29 = vpop.permute.xlu0 %81 }
 0x10c   :  { %v170_v30 = vpop.f32.mrb[0].mxu0 }
 0x10d   :  { %v171_v31 = vadd.f32 %v170_v30, %v82_v29  ;;  %v2806_v32 = vpop.f32.mrb[1].mxu0 }
 0x10f   :  { %v184_v33 = vmax.f32 %v171_v31, 0.0 }
 0x110   :  { %v175_v34 = vpop.f32.mrb[2].mxu0 }
 0x111   :  { %v176_v35 = vadd.f32 %v175_v34, %v87_v28  ;;  %575 = vrot.lane.b32.xlu0 %v184_v33, %s3279_s13  ;;  %v2809_v36 = vpop.f32.mrb[3].mxu0 }
 0x113   :  { %v185_v40 = vmax.f32 %v176_v35, 0.0 }
 0x114   :  { %v3460_v41 = vpop.f32.mrb[4].mxu0 }
 0x115   :  { %91 = vperm.xlu0 %3125, %v76_v38   ;;  %501 = vrot.lane.b32.xlu1 %v185_v40, %s3279_s13  ;;  %v2812_v43 = vpop.f32.mrb[5].mxu0 }
 0x116   :  { %2814 = vmatpush3.xpose.msk.msra.mxu1 %vm94_vm1, %v185_v40 }
 0x117   :  { %2818 = vmatprep.subr.mxu1 %v3277_v1 }
 0x119   :  { %2816 = vmatmul.mubr.msk.f32.vlgmr.msra.gmra.mrb[0].mxu1 %vm94_vm1, %v3392_v12  ;;  %810 = vbcast.lane.b32.xlu0 %v807_v42, 257 }
 0x11a   :  { %2819 = vmatpush3.xpose.msk.msra.mxu1 %vm94_vm1, %v184_v33  ;;  %2820 = vmatprep.mubr.msk.f32.mxu1 %vm3276_vm0, %v3277_v1 }
 0x11b   :  { %2823 = vmatprep.subr.mxu1 %v3277_v1  ;;  %496 = vperm.xlu1 %3126, %v3397_v13  }
 0x11d   :  { %2821 = vmatmul.mubr.msk.f32.vlgmr.msra.gmra.mrb[2].mxu1 %vm94_vm1, %v272_v44  ;;  %826 = vperm.xlu0 %3125, %v3458_v39  }
 0x11e   :  { %2824 = vmatpush3.msra.mxu1 %v185_v40  ;;  %2825 = vmatprep.mubr.msk.f32.mxu1 %vm3276_vm0, %v3277_v1 }
 0x11f   :  { %2828 = vmatprep.subr.mxu1 %v3277_v1  ;;  %3127 = vset.pattern.permute.xlu1 %v3281_v61 }
 0x183   :  { %v576_v51 = vpop.permute.xlu0 %575 }
 0x187   :  { %v502_v46 = vpop.permute.xlu1 %501 }
 0x188   :  { %2844 = vmatpush3.msra.mxu0 %v502_v46 }
 0x189   :  { %3035 = vmatprep.subr.msk.bf16.mxu0 %vm3511_vm3, %v3507_v21 }
 0x194   :  { %v92_v29 = vpop.permute.xlu0 %91 }
 0x195   :  { %v181_v30 = vadd.f32 %v3460_v41, %v92_v29 }
 0x197   :  { %v186_v31 = vmax.f32 %v181_v30, 0.0 }
 0x198   :  { %v811_v40 = vpop.permute.xlu0 %810 }
 0x199   :  { %v187_v32 = vrot.slane %v186_v31, 4 }
 0x1ec   :  { %v267_v47 = vpop.f32.mrb[0].mxu1 }
 0x1ed   :  { %v2817_v48 = vpop.f32.mrb[1].mxu1 }
 0x1f0   :  { %v344_v49 = vpop.f32.mrb[2].mxu1 }
 0x1f1   :  { %v2822_v50 = vpop.f32.mrb[3].mxu1  ;;  %2826 = vmatmul.mubr.msk.f32.vlgmr.msra.gmra.mrb[4].mxu1 %vm348_vm2, %v344_v49 }
 0x1f2   :  { %2829 = vmatpush3.msra.mxu1 %v184_v33  ;;  %2830 = vmatprep.mubr.msk.f32.mxu1 %vm3276_vm0, %v3277_v1  ;;  %v188_v33 = vadd.f32 %v187_v32, %v186_v31 }
 0x1f3   :  { %2833 = vmatprep.subr.mxu1 %v3277_v1 }
 0x1f4   :  { %v189_v35 = vrot.slane %v188_v33, 2 }
 0x1f5   :  { %2831 = vmatmul.mubr.msk.f32.vlgmr.msra.gmra.mrb[6].mxu1 %vm348_vm2, %v267_v47 }
 0x1f6   :  { %2835 = vmatprep.mubr.msk.f32.mxu1 %vm3276_vm0, %v3277_v1  ;;  %v190_v43 = vadd.f32 %v189_v35, %v188_v33 }
 0x1f9   :  { %2834 = vmatpush3.xpose.msk.msra.mxu1 %vm94_vm1, %v502_v46  ;;  %v191_v46 = vrot.slane %v190_v43, 1 }
 0x1fa   :  { %2838 = vmatprep.subr.mxu1 %v3277_v1 }
 0x1fb   :  { %v192_v49 = vadd.f32 %v191_v46, %v190_v43 }
 0x1fc   :  { %2836 = vmatmul.mubr.msk.f32.vlgmr.msra.gmra.mrb[8].mxu1 %vm94_vm1, %v3392_v12  ;;  %v497_v12 = vpop.permute.xlu1 %496 }
 0x1fd   :  { %2839 = vmatpush3.xpose.msk.msra.mxu1 %vm94_vm1, %v576_v51  ;;  %2840 = vmatprep.mubr.msk.f32.mxu1 %vm3276_vm0, %v3277_v1  ;;  %v194_v41 = vmul.f32 0.125, %v192_v49 }
 0x1fe   :  { %2848 = vmatprep.subr.mxu1 %v3277_v1 }
 0x200   :  { %2841 = vmatmul.mubr.msk.f32.vlgmr.msra.gmra.mrb[10].mxu1 %vm94_vm1, %v272_v44 }
 0x201   :  { %2849 = vmatpush3.msra.mxu1 %v576_v51  ;;  %2850 = vmatprep.mubr.msk.f32.mxu1 %vm3276_vm0, %v3277_v1 }
 0x202   :  { %3039 = vmatprep.subr.bf16.mxu1 %v3275_v0 }
 0x2c4   :  { %v418_v52 = vpop.f32.mrb[4].mxu1 }
 0x2c5   :  { %v2827_v53 = vpop.f32.mrb[5].mxu1 }
 0x2c6   :  { %v827_v53 = vpop.permute.xlu0 %826 }
 0x2c8   :  { %v491_v54 = vpop.f32.mrb[6].mxu1 }
 0x2c9   :  { %v492_v55 = vadd.f32 %v491_v54, %v418_v52  ;;  %v2832_v56 = vpop.f32.mrb[7].mxu1 }
 0x2cb   :  { %v499_v34 = vadd.f32 %v497_v12, %v492_v55  ;;  %v829_v55 = vmul.f32 %v827_v53, %v194_v41 }
 0x2cd   :  { %v500_v36 = vmax.f32 %v499_v34, 0.0 }
 0x2cf   :  { %v571_v57 = vpop.f32.mrb[8].mxu1 }
 0x2d0   :  { %v2837_v58 = vpop.f32.mrb[9].mxu1  ;;  %2851 = vmatmul.mubr.msk.f32.vlgmr.msra.gmra.mrb[12].mxu1 %vm348_vm2, %v571_v57 }
 0x2d1   :  { %2887 = vmatprep.mubr.msk.f32.mxu1 %vm3276_vm0, %v3277_v1 }
 0x2d3   :  { %v645_v59 = vpop.f32.mrb[10].mxu1 }
 0x2d4   :  { %v2842_v60 = vpop.f32.mrb[11].mxu1  ;;  %2846 = vmatmul.mubr.msk.f32.vlgmr.msra.gmra.mrb[6].mxu0 %vm348_vm2, %v645_v59 }
 0x2d5   :  { %3038 = vmatpush3.bf16.xpose.msk.msra.mxu0 %vm3511_vm3, %v3507_v21 }
 0x3a3   :  { %v793_v62 = vpop.f32.mrb[12].mxu1 }
 0x3a4   :  { %v2852_v63 = vpop.f32.mrb[13].mxu1 }
 0x3a7   :  { %v719_v6 = vpop.f32.mrb[6].mxu0 }
 0x3a8   :  { %v794_v8 = vadd.f32 %v793_v62, %v719_v6  ;;  %v2847_v9 = vpop.f32.mrb[7].mxu0 }
 0x3aa   :  { %v797_v14 = vadd.f32 %v794_v8, %v497_v12  ;;  %v851_v12 = vsub.s32 1, %v3431_v22 }
 0x3ac   :  { %v798_v17 = vmax.f32 %v797_v14, 0.0 }
 0x3ae   :  { %800 = vrot.lane.b32.xlu1 %v798_v17, %s3279_s13 }
 0x3b2   :  { %820 = vperm.xlu1 %3127, %v3397_v13  }
 0x3b6   :  { %3128 = vset.pattern.permute.xlu1 %v3282_v18 }
 0x3b7   :  { %838 = vperm.xlu1 %3128, %v3397_v13   ;;  %v3521_v13 = vld [vmem:[#allocation5 + $0x10] sm:$0xff] }
 0x3b8   :  { %2857 = vmatprep.subr.msk.mxu0 %vm94_vm1, %v3521_v13 }
 0x3b9   :  { %2858 = vmatpush3.xpose.msk.msra.mxu0 %vm94_vm1, %v3521_v13 }
 0x3ba   :  { %3051 = vmatprep.subr.bf16.mxu0 %v3275_v0 }
 0x3bb   :  { %3129 = vset.pattern.permute.xlu1 %v3278_v2  ;;  %v3531_v2 = vld [vmem:[%s4078_s4] sm:$0xff]  ;;  %s3283_s4 = smov 120  }
 0x3bc   :  { %1172 = vrot.lane.b32.xlu0 %v3531_v2, %s3279_s13 }
 0x420   :  { %v801_v38 = vpop.permute.xlu1 %800 }
 0x421   :  { %v803_v42 = vsel %vm94_vm1, %v500_v36, %v801_v38 }
 0x422   :  { %v812_v44 = vmul.f32 %v811_v40, %v803_v42 }
 0x424   :  { %v813_v45 = vrot.slane %v812_v44, 4 }
 0x426   :  { %v814_v47 = vadd.f32 %v813_v45, %v812_v44 }
 0x428   :  { %v815_v48 = vrot.slane %v814_v47, 2 }
 0x42a   :  { %v816_v50 = vadd.f32 %v815_v48, %v814_v47 }
 0x42c   :  { %v817_v51 = vrot.slane %v816_v50, 1 }
 0x42e   :  { %v818_v52 = vadd.f32 %v817_v51, %v816_v50 }
 0x431   :  { %v821_v54 = vpop.permute.xlu1 %820 }
 0x432   :  { %v823_v56 = vadd.f32 %v821_v54, %v818_v52 }
 0x434   :  { %v830_v57 = vadd.f32 %v829_v55, %v823_v56  ;;  %v3638_v56 = vpop.permute.xlu0 %1172 }
 0x436   :  { %v831_v58 = vmax.f32 %v830_v57, 0.0  ;;  %v839_v59 = vpop.permute.xlu1 %838 }
 0x437   :  { %v840_v61 = vrot.slane %v839_v59, 7 }
 0x438   :  { %v833_v60 = vrot.slane %v831_v58, 7 }
 0x43a   :  { %v835_v62 = vmul.f32 %v833_v60, %v827_v53 }
 0x43c   :  { %v842_v63 = vadd.f32 %v840_v61, %v835_v62 }
 0x43e   :  { %v2588_v6 = vmul.f32 -1.442695, %v842_v63 }
 0x440   :  { %3130 = vpow2.f32 %v2588_v6 }
 0x44a   :  { %v3131_v8 = vpop.eup %3130 }
 0x44b   :  { %v846_v9 = vadd.f32 1.0, %v3131_v8 }
 0x44d   :  { %3132 = vrcp.f32 %v846_v9 }
 0x457   :  { %v3133_v14 = vpop.eup %3132 }
 0x458   :  { %v852_v17 = vrot.slane %v3133_v14, %v851_v12 }
 0x45a   :  { %v3541_v18 = vmul.f32 %v852_v17, %v3369_v3  ;;  %v3544_v19 = vmul.f32 %v852_v17, %v3371_v4  ;;  %v3549_v20 = vmul.f32 %v852_v17, %v3373_v5  ;;  %v3556_v29 = vmul.f32 %v852_v17, %v3377_v7 }
 0x45b   :  { %v3559_v3 = vmul.f32 %v852_v17, %v3385_v10  ;;  %v3566_v4 = vmul.f32 %v852_v17, %v3387_v11  ;;  %v3569_v5 = vmul.f32 %v852_v17, %v3404_v15  ;;  %v3576_v7 = vmul.f32 %v852_v17, %v3406_v16 }
 0x45c   :  { %2859 = vmatprep.mubr.msk.f32.mxu0 %vm94_vm1, %v3541_v18  ;;  %v3585_v10 = vrot.slane %v3437_v24, %v806_v37 }
 0x45d   :  { %2860 = vmatmul.mubr.msk.f32.vlgmr.msra.gmra.mrb[8].mxu0 %vm94_vm1, %v3544_v19 }
 0x45e   :  { %2862 = vmatprep.mubr.msk.f32.mxu0 %vm94_vm1, %v3549_v20 }
 0x461   :  { %2863 = vmatmul.mubr.msk.f32.gmra.mrb[10].mxu0 %vm94_vm1, %v3556_v29 }
 0x462   :  { %2865 = vmatprep.mubr.msk.f32.mxu0 %vm94_vm1, %v3559_v3 }
 0x465   :  { %2866 = vmatmul.mubr.msk.f32.gmra.mrb[12].mxu0 %vm94_vm1, %v3566_v4 }
 0x466   :  { %2868 = vmatprep.mubr.msk.f32.mxu0 %vm94_vm1, %v3569_v5 }
 0x469   :  { %2869 = vmatmul.mubr.msk.f32.gmra.mrb[14].mxu0 %vm94_vm1, %v3576_v7 }
 0x46a   :  { %2906 = vmatprep.mubr.msk.f32.mxu0 %vm3276_vm0, %v3277_v1 }
 0x530   :  { %v2861_v11 = vpop.f32.mrb[8].mxu0 }
 0x531   :  { %v970_v15 = vadd.f32 %v2861_v11, %v3585_v10  ;;  %v964_v30 = vpop.f32.mrb[9].mxu0 }
 0x532   :  { %v965_v31 = vadd.f32 %v964_v30, %v3585_v10 }
 0x533   :  { %v3589_v32 = vmax.f32 %v970_v15, 0.0 }
 0x534   :  { %v3591_v16 = vmax.f32 %v965_v31, 0.0  ;;  %v2864_v33 = vpop.f32.mrb[10].mxu0 }
 0x535   :  { %v980_v34 = vadd.f32 %v2864_v33, %v3585_v10  ;;  %1077 = vrot.lane.b32.xlu0 %v3589_v32, %s3283_s4  ;;  %v974_v35 = vpop.f32.mrb[11].mxu0 }
 0x536   :  { %v975_v37 = vadd.f32 %v974_v35, %v3585_v10  ;;  %1075 = vrot.lane.b32.xlu1 %v3591_v16, %s3283_s4  ;;  %v3052_v36 = vpack.c.bf16 %v3589_v32, %v3591_v16 }
 0x537   :  { %v3601_v38 = vmax.f32 %v980_v34, 0.0 }
 0x538   :  { %v3603_v40 = vmax.f32 %v975_v37, 0.0  ;;  %v2867_v42 = vpop.f32.mrb[12].mxu0  ;;  %3053 = vmatpush3.bf16.msra.mxu0 %v3052_v36 }
 0x539   :  { %v990_v43 = vadd.f32 %v2867_v42, %v3585_v10  ;;  %1081 = vrot.lane.b32.xlu0 %v3601_v38, %s3283_s4  ;;  %v984_v44 = vpop.f32.mrb[13].mxu0  ;;  %3054 = vmatprep.subr.bf16.mxu0 %v3275_v0 }
 0x53a   :  { %v985_v45 = vadd.f32 %v984_v44, %v3585_v10  ;;  %1079 = vrot.lane.b32.xlu1 %v3603_v40, %s3283_s4  ;;  %v3055_v46 = vpack.c.bf16 %v3601_v38, %v3603_v40 }
 0x53b   :  { %v3614_v47 = vmax.f32 %v990_v43, 0.0 }
 0x53c   :  { %v3616_v48 = vmax.f32 %v985_v45, 0.0  ;;  %v2870_v49 = vpop.f32.mrb[14].mxu0  ;;  %3056 = vmatpush3.bf16.msra.mxu0 %v3055_v46 }
 0x53d   :  { %v1000_v50 = vadd.f32 %v2870_v49, %v3585_v10  ;;  %1085 = vrot.lane.b32.xlu0 %v3614_v47, %s3283_s4  ;;  %v994_v51 = vpop.f32.mrb[15].mxu0  ;;  %3057 = vmatprep.subr.bf16.mxu0 %v3275_v0 }
 0x53e   :  { %v995_v41 = vadd.f32 %v994_v51, %v3585_v10  ;;  %1083 = vrot.lane.b32.xlu1 %v3616_v48, %s3283_s4  ;;  %v3058_v52 = vpack.c.bf16 %v3614_v47, %v3616_v48 }
 0x53f   :  { %v3627_v53 = vmax.f32 %v1000_v50, 0.0 }
 0x540   :  { %v3629_v54 = vmax.f32 %v995_v41, 0.0  ;;  %3059 = vmatpush3.bf16.msra.mxu0 %v3058_v52 }
 0x541   :  { %1089 = vrot.lane.b32.xlu0 %v3627_v53, %s3283_s4  ;;  %3060 = vmatprep.subr.bf16.mxu0 %v3275_v0 }
 0x542   :  { %1087 = vrot.lane.b32.xlu1 %v3629_v54, %s3283_s4  ;;  %v3061_v55 = vpack.c.bf16 %v3627_v53, %v3629_v54 }
 0x544   :  { %3062 = vmatpush3.bf16.msra.mxu0 %v3061_v55 }
 0x545   :  { %1720 = vrot.lane.b32.xlu0 %v3544_v19, %s3279_s13 }
 0x546   :  { %1718 = vrot.lane.b32.xlu1 %v3541_v18, %s3279_s13 }
 0x547   :  { %2907 = vmatmul.mubr.msk.f32.vlgmr.msra.gmra.mrb[16].mxu0 %vm94_vm1, %v3638_v56 }
 0x549   :  { %1724 = vrot.lane.b32.xlu0 %v3556_v29, %s3279_s13 }
 0x54a   :  { %1722 = vrot.lane.b32.xlu1 %v3549_v20, %s3279_s13 }
 0x54d   :  { %1728 = vrot.lane.b32.xlu0 %v3566_v4, %s3279_s13 }
 0x54e   :  { %1726 = vrot.lane.b32.xlu1 %v3559_v3, %s3279_s13 }
 0x551   :  { %1732 = vrot.lane.b32.xlu0 %v3576_v7, %s3279_s13 }
 0x552   :  { %1730 = vrot.lane.b32.xlu1 %v3569_v5, %s3279_s13 }
 0x5a7   :  { %v1078_v57 = vpop.permute.xlu0 %1077 }
 0x5a8   :  { %v1076_v58 = vpop.permute.xlu1 %1075 }
 0x5a9   :  { %v3040_v59 = vpack.c.bf16 %v1078_v57, %v1076_v58  ;;  %2911 = vmatprep.mubr.msk.f32.mxu0 %vm348_vm2, %v1076_v58 }
 0x5ab   :  { %v1082_v60 = vpop.permute.xlu0 %1081  ;;  %3041 = vmatpush3.bf16.msra.mxu1 %v3040_v59 }
 0x5ac   :  { %v1080_v61 = vpop.permute.xlu1 %1079  ;;  %3042 = vmatprep.subr.bf16.mxu1 %v3275_v0 }
 0x5ad   :  { %v3043_v62 = vpack.c.bf16 %v1082_v60, %v1080_v61 }
 0x5af   :  { %v1086_v63 = vpop.permute.xlu0 %1085  ;;  %3044 = vmatpush3.bf16.msra.mxu1 %v3043_v62 }
 0x5b0   :  { %v1084_v6 = vpop.permute.xlu1 %1083  ;;  %3045 = vmatprep.subr.bf16.mxu1 %v3275_v0 }
 0x5b1   :  { %v3046_v8 = vpack.c.bf16 %v1086_v63, %v1084_v6 }
 0x5b3   :  { %v1090_v9 = vpop.permute.xlu0 %1089  ;;  %3047 = vmatpush3.bf16.msra.mxu1 %v3046_v8 }
 0x5b4   :  { %v1088_v14 = vpop.permute.xlu1 %1087  ;;  %3048 = vmatprep.subr.bf16.mxu1 %v3275_v0 }
 0x5b5   :  { %v3049_v17 = vpack.c.bf16 %v1090_v9, %v1088_v14 }
 0x5b7   :  { %3050 = vmatpush3.bf16.msra.mxu1 %v3049_v17  ;;  %v1721_v31 = vpop.permute.xlu0 %1720 }
 0x5b8   :  { %v1719_v30 = vpop.permute.xlu1 %1718 }
 0x5ba   :  { %2888 = vmatmul.mubr.msk.f32.vlgmr.msra.gmra.mrb[14].mxu1 %vm94_vm1, %v3531_v2 }
 0x5bb   :  { %2925 = vmatprep.mubr.msk.f32.mxu1 %vm348_vm2, %v3591_v16 }
 0x5bc   :  { %v1723_v28 = vpop.permute.xlu1 %1722 }
 0x5c0   :  { %v1727_v33 = vpop.permute.xlu1 %1726 }
 0x5c4   :  { %v1731_v35 = vpop.permute.xlu1 %1730 }
 0x61a   :  { %v1242_v11 = vpop.f32.mrb[16].mxu0 }
 0x61b   :  { %v2908_v15 = vpop.f32.mrb[17].mxu0  ;;  %2909 = vmatprep.subr.msk.mxu0 %vm348_vm2, %v1242_v11 }
 0x61c   :  { %2910 = vmatpush3.xpose.msk.msra.mxu0 %vm348_vm2, %v1242_v11 }
 0x61d   :  { %3065 = vmatprep.subr.msk.bf16.mxu0 %vm3511_vm3, %v3507_v21 }
 0x61f   :  { %2912 = vmatmul.mubr.msk.f32.vlgmr.msra.gmra.mrb[18].mxu0 %vm348_vm2, %v1078_v57 }
 0x620   :  { %2914 = vmatprep.mubr.msk.f32.mxu0 %vm348_vm2, %v1080_v61  ;;  %3068 = vmatpush3.bf16.xpose.msk.msra.mxu0 %vm3511_vm3, %v3507_v21  ;;  %v1725_v21 = vpop.permute.xlu0 %1724 }
 0x621   :  { %2941 = vmatprep.subr.msk.mxu0 %vm94_vm1, %v3521_v13 }
 0x623   :  { %2915 = vmatmul.mubr.msk.f32.gmra.mrb[20].mxu0 %vm348_vm2, %v1082_v60 }
 0x624   :  { %2917 = vmatprep.mubr.msk.f32.mxu0 %vm348_vm2, %v1084_v6  ;;  %v1729_v34 = vpop.permute.xlu0 %1728 }
 0x627   :  { %2918 = vmatmul.mubr.msk.f32.gmra.mrb[22].mxu0 %vm348_vm2, %v1086_v63 }
 0x628   :  { %2920 = vmatprep.mubr.msk.f32.mxu0 %vm348_vm2, %v1088_v14  ;;  %2942 = vmatpush3.xpose.msk.msra.mxu0 %vm94_vm1, %v3521_v13  ;;  %v1733_v13 = vpop.permute.xlu0 %1732 }
 0x629   :  { %3081 = vmatprep.subr.bf16.mxu0 %v3275_v0 }
 0x62b   :  { %2921 = vmatmul.mubr.msk.f32.gmra.mrb[24].mxu0 %vm348_vm2, %v1090_v9 }
 0x62c   :  { %2943 = vmatprep.mubr.msk.f32.mxu0 %vm94_vm1, %v1719_v30 }
 0x62f   :  { %2944 = vmatmul.mubr.msk.f32.vlgmr.msra.gmra.mrb[26].mxu0 %vm94_vm1, %v1721_v31 }
 0x630   :  { %2946 = vmatprep.mubr.msk.f32.mxu0 %vm94_vm1, %v1723_v28 }
 0x633   :  { %2947 = vmatmul.mubr.msk.f32.gmra.mrb[28].mxu0 %vm94_vm1, %v1725_v21 }
 0x634   :  { %2949 = vmatprep.mubr.msk.f32.mxu0 %vm94_vm1, %v1727_v33 }
 0x637   :  { %2950 = vmatmul.mubr.msk.f32.gmra.mrb[30].mxu0 %vm94_vm1, %v1729_v34 }
 0x638   :  { %2952 = vmatprep.mubr.msk.f32.mxu0 %vm94_vm1, %v1731_v35 }
 0x63b   :  { %2953 = vmatmul.mubr.msk.f32.gmra.mrb[32].mxu0 %vm94_vm1, %v1733_v13 }
 0x63c   :  { %2990 = vmatprep.mubr.msk.f32.mxu0 %vm3276_vm0, %v3277_v1 }
 0x68d   :  { %v1168_v37 = vpop.f32.mrb[14].mxu1 }
 0x68e   :  { %2923 = vmatprep.subr.msk.mxu1 %vm348_vm2, %v1168_v37  ;;  %v2889_v36 = vpop.f32.mrb[15].mxu1 }
 0x68f   :  { %2924 = vmatpush3.xpose.msk.msra.mxu1 %vm348_vm2, %v1168_v37 }
 0x690   :  { %3069 = vmatprep.subr.bf16.mxu1 %v3275_v0 }
 0x692   :  { %2926 = vmatmul.mubr.msk.f32.vlgmr.msra.gmra.mrb[16].mxu1 %vm348_vm2, %v3589_v32 }
 0x693   :  { %2928 = vmatprep.mubr.msk.f32.mxu1 %vm348_vm2, %v3603_v40 }
 0x696   :  { %2929 = vmatmul.mubr.msk.f32.gmra.mrb[18].mxu1 %vm348_vm2, %v3601_v38 }
 0x697   :  { %2931 = vmatprep.mubr.msk.f32.mxu1 %vm348_vm2, %v3616_v48 }
 0x69a   :  { %2932 = vmatmul.mubr.msk.f32.gmra.mrb[20].mxu1 %vm348_vm2, %v3614_v47 }
 0x69b   :  { %2934 = vmatprep.mubr.msk.f32.mxu1 %vm348_vm2, %v3629_v54 }
 0x69e   :  { %2935 = vmatmul.mubr.msk.f32.gmra.mrb[22].mxu1 %vm348_vm2, %v3627_v53 }
 0x69f   :  { %2971 = vmatprep.mubr.msk.f32.mxu1 %vm3276_vm0, %v3277_v1 }
 0x6f2   :  { %v2913_v42 = vpop.f32.mrb[18].mxu0 }
 0x6f3   :  { %v3715_v43 = vpop.f32.mrb[19].mxu0 }
 0x6f6   :  { %v3717_v44 = vpop.f32.mrb[20].mxu0 }
 0x6f7   :  { %v3719_v45 = vpop.f32.mrb[21].mxu0 }
 0x6fa   :  { %v3721_v46 = vpop.f32.mrb[22].mxu0 }
 0x6fb   :  { %v3723_v49 = vpop.f32.mrb[23].mxu0 }
 0x6fe   :  { %v3725_v50 = vpop.f32.mrb[24].mxu0 }
 0x6ff   :  { %v3727_v51 = vpop.f32.mrb[25].mxu0 }
 0x702   :  { %v2945_v41 = vpop.f32.mrb[26].mxu0 }
 0x703   :  { %v1822_v52 = vadd.f32 %v2945_v41, %v3585_v10  ;;  %v1816_v55 = vpop.f32.mrb[27].mxu0 }
 0x704   :  { %v1817_v1 = vadd.f32 %v1816_v55, %v3585_v10 }
 0x705   :  { %v3731_v57 = vmax.f32 %v1822_v52, 0.0 }
 0x706   :  { %v3733_v58 = vmax.f32 %v1817_v1, 0.0  ;;  %v2948_v59 = vpop.f32.mrb[28].mxu0 }
 0x707   :  { %v1832_v60 = vadd.f32 %v2948_v59, %v3585_v10  ;;  %1929 = vrot.lane.b32.xlu0 %v3731_v57, %s3283_s4  ;;  %v1826_v61 = vpop.f32.mrb[29].mxu0 }
 0x708   :  { %v1827_v62 = vadd.f32 %v1826_v61, %v3585_v10  ;;  %1927 = vrot.lane.b32.xlu1 %v3733_v58, %s3283_s4  ;;  %v3082_v63 = vpack.c.bf16 %v3731_v57, %v3733_v58 }
 0x709   :  { %v3743_v6 = vmax.f32 %v1832_v60, 0.0 }
 0x70a   :  { %v3745_v8 = vmax.f32 %v1827_v62, 0.0  ;;  %v2951_v9 = vpop.f32.mrb[30].mxu0  ;;  %3083 = vmatpush3.bf16.msra.mxu0 %v3082_v63 }
 0x70b   :  { %v1842_v14 = vadd.f32 %v2951_v9, %v3585_v10  ;;  %1933 = vrot.lane.b32.xlu0 %v3743_v6, %s3283_s4  ;;  %v1836_v17 = vpop.f32.mrb[31].mxu0  ;;  %3084 = vmatprep.subr.bf16.mxu0 %v3275_v0 }
 0x70c   :  { %v1837_v11 = vadd.f32 %v1836_v17, %v3585_v10  ;;  %1931 = vrot.lane.b32.xlu1 %v3745_v8, %s3283_s4  ;;  %v3085_v15 = vpack.c.bf16 %v3743_v6, %v3745_v8 }
 0x70d   :  { %v3756_v30 = vmax.f32 %v1842_v14, 0.0 }
 0x70e   :  { %v3758_v31 = vmax.f32 %v1837_v11, 0.0  ;;  %v2954_v28 = vpop.f32.mrb[32].mxu0  ;;  %3086 = vmatpush3.bf16.msra.mxu0 %v3085_v15 }
 0x70f   :  { %v1852_v21 = vadd.f32 %v2954_v28, %v3585_v10  ;;  %1937 = vrot.lane.b32.xlu0 %v3756_v30, %s3283_s4  ;;  %v1846_v33 = vpop.f32.mrb[33].mxu0  ;;  %3087 = vmatprep.subr.bf16.mxu0 %v3275_v0  ;;  %v3832_v28 = vrot.slane %v3458_v39, %v1516_v23 }
 0x710   :  { %v1847_v34 = vadd.f32 %v1846_v33, %v3585_v10  ;;  %1935 = vrot.lane.b32.xlu1 %v3758_v31, %s3283_s4  ;;  %v3088_v35 = vpack.c.bf16 %v3756_v30, %v3758_v31 }
 0x711   :  { %v3769_v13 = vmax.f32 %v1852_v21, 0.0 }
 0x712   :  { %v3771_v37 = vmax.f32 %v1847_v34, 0.0  ;;  %3089 = vmatpush3.bf16.msra.mxu0 %v3088_v35 }
 0x713   :  { %1941 = vrot.lane.b32.xlu0 %v3769_v13, %s3283_s4  ;;  %3090 = vmatprep.subr.bf16.mxu0 %v3275_v0 }
 0x714   :  { %1939 = vrot.lane.b32.xlu1 %v3771_v37, %s3283_s4  ;;  %v3091_v10 = vpack.c.bf16 %v3769_v13, %v3771_v37 }
 0x716   :  { %3092 = vmatpush3.bf16.msra.mxu0 %v3091_v10 }
 0x717   :  { %1021 = vrot.lane.b32.xlu0 %v3589_v32, %s3284_s26 }
 0x718   :  { %1019 = vrot.lane.b32.xlu1 %v3591_v16, %s3284_s26 }
 0x719   :  { %2991 = vmatmul.mubr.msk.f32.vlgmr.msra.gmra.mrb[34].mxu0 %vm94_vm1, %v3638_v56 }
 0x71b   :  { %1025 = vrot.lane.b32.xlu0 %v3601_v38, %s3284_s26 }
 0x71c   :  { %1023 = vrot.lane.b32.xlu1 %v3603_v40, %s3284_s26 }
 0x71f   :  { %1029 = vrot.lane.b32.xlu0 %v3614_v47, %s3284_s26 }
 0x720   :  { %1027 = vrot.lane.b32.xlu1 %v3616_v48, %s3284_s26 }
 0x723   :  { %1033 = vrot.lane.b32.xlu0 %v3627_v53, %s3284_s26 }
 0x724   :  { %1031 = vrot.lane.b32.xlu1 %v3629_v54, %s3284_s26 }
 0x765   :  { %v2927_v32 = vpop.f32.mrb[16].mxu1 }
 0x766   :  { %v3798_v16 = vadd.f32 %v2927_v32, %v2913_v42  ;;  %v1455_v56 = vpop.f32.mrb[17].mxu1 }
 0x767   :  { %v3801_v38 = vadd.f32 %v1455_v56, %v3715_v43 }
 0x769   :  { %v2930_v40 = vpop.f32.mrb[18].mxu1 }
 0x76a   :  { %v3804_v36 = vadd.f32 %v2930_v40, %v3717_v44  ;;  %v1465_v47 = vpop.f32.mrb[19].mxu1 }
 0x76b   :  { %v3807_v48 = vadd.f32 %v1465_v47, %v3719_v45 }
 0x76d   :  { %v2933_v41 = vpop.f32.mrb[20].mxu1 }
 0x76e   :  { %v3810_v53 = vadd.f32 %v2933_v41, %v3721_v46  ;;  %v1475_v54 = vpop.f32.mrb[21].mxu1 }
 0x76f   :  { %v3813_v42 = vadd.f32 %v1475_v54, %v3723_v49  ;;  %v3871_v54 = vrot.slane %v3437_v24, %v851_v12 }
 0x771   :  { %v2936_v52 = vpop.f32.mrb[22].mxu1 }
 0x772   :  { %v3816_v43 = vadd.f32 %v2936_v52, %v3725_v50  ;;  %v1485_v55 = vpop.f32.mrb[23].mxu1  ;;  %v1499_v52 = vadd.f32 %v3871_v54, %v3798_v16  ;;  %v1503_v16 = vadd.f32 %v3871_v54, %v3810_v53 }
 0x773   :  { %v3819_v44 = vadd.f32 %v1485_v55, %v3727_v51  ;;  %v1498_v55 = vadd.f32 %v3871_v54, %v3801_v38  ;;  %v1502_v38 = vadd.f32 %v3871_v54, %v3813_v42 }
 0x774   :  { %v1505_v42 = vadd.f32 %v3871_v54, %v3816_v43 }
 0x775   :  { %v1510_v53 = vmax.f32 %v1502_v38, 0.0 }
 0x779   :  { %v1930_v1 = vpop.permute.xlu0 %1929 }
 0x77a   :  { %v1928_v59 = vpop.permute.xlu1 %1927 }
 0x77b   :  { %v3070_v45 = vpack.c.bf16 %v1930_v1, %v1928_v59 }
 0x77d   :  { %v1934_v60 = vpop.permute.xlu0 %1933  ;;  %3071 = vmatpush3.bf16.msra.mxu1 %v3070_v45 }
 0x77e   :  { %v1932_v61 = vpop.permute.xlu1 %1931  ;;  %3072 = vmatprep.subr.bf16.mxu1 %v3275_v0 }
 0x77f   :  { %v3073_v46 = vpack.c.bf16 %v1934_v60, %v1932_v61 }
 0x781   :  { %v1938_v62 = vpop.permute.xlu0 %1937  ;;  %3074 = vmatpush3.bf16.msra.mxu1 %v3073_v46 }
 0x782   :  { %v1936_v49 = vpop.permute.xlu1 %1935  ;;  %3075 = vmatprep.subr.bf16.mxu1 %v3275_v0 }
 0x783   :  { %v3076_v50 = vpack.c.bf16 %v1938_v62, %v1936_v49 }
 0x785   :  { %v1942_v63 = vpop.permute.xlu0 %1941  ;;  %3077 = vmatpush3.bf16.msra.mxu1 %v3076_v50 }
 0x786   :  { %v1940_v9 = vpop.permute.xlu1 %1939  ;;  %3078 = vmatprep.subr.bf16.mxu1 %v3275_v0 }
 0x787   :  { %v3079_v51 = vpack.c.bf16 %v1942_v63, %v1940_v9 }
 0x789   :  { %v1022_v14 = vpop.permute.xlu0 %1021  ;;  %3080 = vmatpush3.bf16.msra.mxu1 %v3079_v51  ;;  %v1511_v51 = vmax.f32 %v1503_v16, 0.0 }
 0x78a   :  { %v1020_v17 = vpop.permute.xlu1 %1019  ;;  %v1046_v11 = vsel %vm348_vm2, %v1022_v14, 0.0 }
 0x78b   :  { %1047 = vadd.xlane.f32.xlu0 %v1046_v11  ;;  %v1043_v15 = vsel %vm348_vm2, %v1020_v17, 0.0 }
 0x78c   :  { %2972 = vmatmul.mubr.msk.f32.vlgmr.msra.gmra.mrb[24].mxu1 %vm94_vm1, %v3531_v2  ;;  %1044 = vadd.xlane.f32.xlu1 %v1043_v15 }
 0x78d   :  { %2995 = vmatprep.mubr.msk.f32.mxu1 %vm348_vm2, %v1928_v59  ;;  %v1026_v23 = vpop.permute.xlu0 %1025  ;;  %v1500_v59 = vadd.f32 %v3871_v54, %v3807_v48 }
 0x78e   :  { %v1024_v0 = vpop.permute.xlu1 %1023  ;;  %v1052_v10 = vsel %vm348_vm2, %v1026_v23, 0.0  ;;  %v1504_v23 = vadd.f32 %v3871_v54, %v3819_v44 }
 0x78f   :  { %v1049_v39 = vsel %vm348_vm2, %v1024_v0, 0.0  ;;  %v1508_v12 = vmax.f32 %v1500_v59, 0.0  ;;  %v1513_v0 = vmax.f32 %v1505_v42, 0.0 }
 0x791   :  { %v1030_v21 = vpop.permute.xlu0 %1029 }
 0x792   :  { %v1028_v2 = vpop.permute.xlu1 %1027  ;;  %v1058_v34 = vsel %vm348_vm2, %v1030_v21, 0.0 }
 0x793   :  { %v1055_v33 = vsel %vm348_vm2, %v1028_v2, 0.0 }
 0x795   :  { %v1034_v35 = vpop.permute.xlu0 %1033 }
 0x796   :  { %v1032_v32 = vpop.permute.xlu1 %1031  ;;  %v1064_v56 = vsel %vm348_vm2, %v1034_v35, 0.0 }
 0x797   :  { %v1061_v40 = vsel %vm348_vm2, %v1032_v32, 0.0 }
 0x79d   :  { %1871 = vrot.lane.b32.xlu1 %v3733_v58, %s3284_s26 }
 0x7a1   :  { %1519 = vrot.lane.b32.xlu0 %v3832_v28, %s3285_s27  ;;  %1873 = vrot.lane.b32.xlu1 %v3731_v57, %s3284_s26 }
 0x7a5   :  { %1875 = vrot.lane.b32.xlu0 %v3745_v8, %s3284_s26  ;;  %1877 = vrot.lane.b32.xlu1 %v3743_v6, %s3284_s26 }
 0x7a9   :  { %1879 = vrot.lane.b32.xlu0 %v3758_v31, %s3284_s26  ;;  %1881 = vrot.lane.b32.xlu1 %v3756_v30, %s3284_s26 }
 0x7ad   :  { %1885 = vrot.lane.b32.xlu1 %v3769_v13, %s3284_s26 }
 0x7c8   :  { %1050 = vadd.xlane.f32.xlu0 %v1049_v39 }
 0x7cc   :  { %1056 = vadd.xlane.f32.xlu0 %v1055_v33  ;;  %v1512_v33 = vmax.f32 %v1504_v23, 0.0 }
 0x7d0   :  { %1059 = vadd.xlane.f32.xlu0 %v1058_v34 }
 0x7d1   :  { %1053 = vadd.xlane.f32.xlu1 %v1052_v10 }
 0x7d4   :  { %1065 = vadd.xlane.f32.xlu0 %v1064_v56 }
 0x7d5   :  { %1062 = vadd.xlane.f32.xlu1 %v1061_v40 }
 0x7ea   :  { %1883 = vrot.lane.b32.xlu0 %v3771_v37, %s3284_s26 }
 0x7ec   :  { %v2087_v47 = vpop.f32.mrb[34].mxu0 }
 0x7ed   :  { %v2992_v41 = vpop.f32.mrb[35].mxu0  ;;  %2993 = vmatprep.subr.msk.mxu1 %vm348_vm2, %v2087_v47 }
 0x7ee   :  { %2994 = vmatpush3.xpose.msk.msra.mxu1 %vm348_vm2, %v2087_v47 }
 0x7f1   :  { %2996 = vmatmul.mubr.msk.f32.vlgmr.msra.gmra.mrb[26].mxu1 %vm348_vm2, %v1930_v1  ;;  %v1501_v1 = vadd.f32 %v3871_v54, %v3804_v36 }
 0x7f2   :  { %2998 = vmatprep.mubr.msk.f32.mxu1 %vm348_vm2, %v1932_v61  ;;  %v1506_v61 = vmax.f32 %v1498_v55, 0.0 }
 0x7f3   :  { %v1509_v24 = vmax.f32 %v1501_v1, 0.0 }
 0x7f5   :  { %2999 = vmatmul.mubr.msk.f32.gmra.mrb[28].mxu1 %vm348_vm2, %v1934_v60  ;;  %v1507_v60 = vmax.f32 %v1499_v52, 0.0 }
 0x7f6   :  { %3001 = vmatprep.mubr.msk.f32.mxu1 %vm348_vm2, %v1936_v49 }
 0x7f9   :  { %3002 = vmatmul.mubr.msk.f32.gmra.mrb[30].mxu1 %vm348_vm2, %v1938_v62 }
 0x7fa   :  { %3004 = vmatprep.mubr.msk.f32.mxu1 %vm348_vm2, %v1940_v9 }
 0x7fd   :  { %3005 = vmatmul.mubr.msk.f32.gmra.mrb[32].mxu1 %vm348_vm2, %v1942_v63 }
 0x7fe   :  { %3009 = vmatprep.mubr.msk.f32.mxu1 %vm348_vm2, %v3733_v58 }
 0x818   :  { %v3881_v45 = vpop.xlane.xlu0 %1047 }
 0x819   :  { %v3883_v58 = vpop.xlane.xlu1 %1044 }
 0x81c   :  { %v3885_v46 = vpop.permute.xlu0 %1519 }
 0x81d   :  { %v1523_v36 = vmul.f32 %v3885_v46, %v1507_v60  ;;  %v1522_v48 = vmul.f32 %v3885_v46, %v1506_v61  ;;  %v1525_v50 = vmul.f32 %v3885_v46, %v1509_v24  ;;  %v1524_v63 = vmul.f32 %v3885_v46, %v1508_v12  ;;  %v1872_v9 = vpop.permute.xlu1 %1871 }
 0x81e   :  { %v1527_v11 = vmul.f32 %v3885_v46, %v1511_v51  ;;  %v1526_v15 = vmul.f32 %v3885_v46, %v1510_v53  ;;  %v1529_v43 = vmul.f32 %v3885_v46, %v1513_v0  ;;  %v1528_v10 = vmul.f32 %v3885_v46, %v1512_v33 }
 0x81f   :  { %v1533_v62 = vsel %vm348_vm2, %v1523_v36, 0.0  ;;  %v1530_v49 = vsel %vm348_vm2, %v1522_v48, 0.0  ;;  %v1539_v14 = vsel %vm348_vm2, %v1525_v50, 0.0  ;;  %v1536_v17 = vsel %vm348_vm2, %v1524_v63, 0.0 }
 0x820   :  { %1534 = vadd.xlane.f32.xlu0 %v1533_v62  ;;  %1531 = vadd.xlane.f32.xlu1 %v1530_v49  ;;  %v1545_v2 = vsel %vm348_vm2, %v1527_v11, 0.0  ;;  %v1542_v21 = vsel %vm348_vm2, %v1526_v15, 0.0  ;;  %v1551_v34 = vsel %vm348_vm2, %v1529_v43, 0.0  ;;  %v1876_v44 = vpop.permute.xlu0 %1875  ;;  %v1895_v56 = vsel %vm348_vm2, %v1872_v9, 0.0 }
 0x821   :  { %v1874_v39 = vpop.permute.xlu1 %1873  ;;  %v1548_v40 = vsel %vm348_vm2, %v1528_v10, 0.0  ;;  %v1901_v41 = vsel %vm348_vm2, %v1876_v44, 0.0  ;;  %v1067_v51 = vmul.f32 0.125, %v3883_v58 }
 0x822   :  { %v1898_v35 = vsel %vm348_vm2, %v1874_v39, 0.0 }
 0x824   :  { %1540 = vadd.xlane.f32.xlu0 %v1539_v14  ;;  %1537 = vadd.xlane.f32.xlu1 %v1536_v17  ;;  %v1880_v55 = vpop.permute.xlu0 %1879 }
 0x825   :  { %v1878_v32 = vpop.permute.xlu1 %1877  ;;  %v1907_v1 = vsel %vm348_vm2, %v1880_v55, 0.0 }
 0x826   :  { %v1904_v52 = vsel %vm348_vm2, %v1878_v32, 0.0 }
 0x828   :  { %1546 = vadd.xlane.f32.xlu0 %v1545_v2  ;;  %1543 = vadd.xlane.f32.xlu1 %v1542_v21 }
 0x829   :  { %v1882_v47 = vpop.permute.xlu1 %1881 }
 0x82a   :  { %v1910_v59 = vsel %vm348_vm2, %v1882_v47, 0.0 }
 0x82c   :  { %1552 = vadd.xlane.f32.xlu0 %v1551_v34  ;;  %1899 = vadd.xlane.f32.xlu1 %v1898_v35 }
 0x82d   :  { %v1886_v60 = vpop.permute.xlu1 %1885 }
 0x82e   :  { %v1916_v61 = vsel %vm348_vm2, %v1886_v60, 0.0 }
 0x830   :  { %1896 = vadd.xlane.f32.xlu0 %v1895_v56  ;;  %1549 = vadd.xlane.f32.xlu1 %v1548_v40 }
 0x834   :  { %1902 = vadd.xlane.f32.xlu0 %v1901_v41  ;;  %1905 = vadd.xlane.f32.xlu1 %v1904_v52 }
 0x838   :  { %1908 = vadd.xlane.f32.xlu0 %v1907_v1  ;;  %1911 = vadd.xlane.f32.xlu1 %v1910_v59 }
 0x83c   :  { %1917 = vadd.xlane.f32.xlu1 %v1916_v61 }
 0x855   :  { %v1051_v24 = vpop.xlane.xlu0 %1050 }
 0x856   :  { %v1069_v42 = vmul.f32 0.125, %v1051_v24 }
 0x858   :  { %v1568_v58 = vmul.f32 %v3832_v28, %v1069_v42 }
 0x859   :  { %v1057_v12 = vpop.xlane.xlu0 %1056 }
 0x85a   :  { %v1071_v21 = vmul.f32 0.125, %v1057_v12 }
 0x85c   :  { %v1570_v47 = vmul.f32 %v3832_v28, %v1071_v21 }
 0x85d   :  { %v1060_v16 = vpop.xlane.xlu0 %1059 }
 0x85e   :  { %v1072_v32 = vmul.f32 0.125, %v1060_v16 }
 0x85f   :  { %v2017_v38 = vpop.f32.mrb[24].mxu1 }
 0x860   :  { %v2973_v36 = vpop.f32.mrb[25].mxu1  ;;  %3007 = vmatprep.subr.msk.mxu1 %vm348_vm2, %v2017_v38  ;;  %v1571_v60 = vmul.f32 %v3832_v28, %v1072_v32 }
 0x861   :  { %v1066_v48 = vpop.xlane.xlu0 %1065  ;;  %3008 = vmatpush3.xpose.msk.msra.mxu1 %vm348_vm2, %v2017_v38 }
 0x862   :  { %v1074_v61 = vmul.f32 0.125, %v1066_v48 }
 0x864   :  { %3010 = vmatmul.mubr.msk.f32.vlgmr.msra.gmra.mrb[26].mxu1 %vm348_vm2, %v3731_v57  ;;  %v1054_v57 = vpop.xlane.xlu1 %1053 }
 0x865   :  { %v1884_v62 = vpop.permute.xlu0 %1883  ;;  %3012 = vmatprep.mubr.msk.f32.mxu1 %vm348_vm2, %v3745_v8  ;;  %v1070_v15 = vmul.f32 0.125, %v1054_v57 }
 0x866   :  { %v1913_v49 = vsel %vm348_vm2, %v1884_v62, 0.0 }
 0x867   :  { %1914 = vadd.xlane.f32.xlu0 %v1913_v49  ;;  %v1569_v35 = vmul.f32 %v3832_v28, %v1070_v15 }
 0x868   :  { %3013 = vmatmul.mubr.msk.f32.gmra.mrb[28].mxu1 %vm348_vm2, %v3743_v6  ;;  %v1063_v8 = vpop.xlane.xlu1 %1062 }
 0x869   :  { %3015 = vmatprep.mubr.msk.f32.mxu1 %vm348_vm2, %v3758_v31  ;;  %v1068_v31 = vmul.f32 0.125, %v3881_v45  ;;  %v3198_v45 = vld [vmem:[%s4079_s5] sm:$0xf]  ;;  %v1073_v41 = vmul.f32 0.125, %v1063_v8  ;;  %s3286_s5 = smov [#allocation7]  }
 0x86a   :  { %v3951_v2 = vrot.slane %v3198_v45, %v1592_v25  ;;  %s2560_s28 = sshll.u32 %s3286_s5, 4  ;;  %s2561_s28 = int_to_ptr.vmem [resolvable:$true] %s2560_s28 }
 0x86b   :  { %v1567_v11 = vmul.f32 %v3832_v28, %v1068_v31  ;;  %v1572_v16 = vmul.f32 %v3832_v28, %v1073_v41  ;;  %s3243_s3 = scalar_lea.vmem %s2561_s28, 1024  ;;  %p3248_p3 = scmp.lt.s32.totalorder %s2561_s28, %s2561_s28 }
 0x86c   :  { %3016 = vmatmul.mubr.msk.f32.gmra.mrb[30].mxu1 %vm348_vm2, %v3756_v30  ;;  %v1566_v30 = vmul.f32 %v3832_v28, %v1067_v51  ;;  %v1573_v51 = vmul.f32 %v3832_v28, %v1074_v61  ;;  %p3244_p2 = scmp.ne.s32.totalorder %s2561_s28, %s3243_s3  ;;  %p3249_p4 = scmp.lt.s32.totalorder %s3243_s3, %s3243_s3 }
 0x86d   :  { %3018 = vmatprep.mubr.msk.f32.mxu1 %vm348_vm2, %v3771_v37 }
 0x86e   :  { %p3250_p5 = por %p3249_p4, %p3248_p3 }
 0x870   :  { %3019 = vmatmul.mubr.msk.f32.gmra.mrb[32].mxu1 %vm348_vm2, %v3769_v13  ;;  %p3251_p6 = pnand %p3250_p5, %p3244_p2 }
 0x8ad   :  { %v1532_v50 = vpop.xlane.xlu1 %1531  ;;  %v1535_v9 = vpop.xlane.xlu0 %1534 }
 0x8ae   :  { %v1558_v53 = vadd.f32 %v3443_v26, %v1532_v50  ;;  %v1559_v37 = vadd.f32 %v3443_v26, %v1535_v9 }
 0x8b0   :  { %v1574_v17 = vadd.f32 %v1566_v30, %v1558_v53  ;;  %v1575_v23 = vadd.f32 %v1567_v11, %v1559_v37 }
 0x8b1   :  { %v1538_v63 = vpop.xlane.xlu1 %1537  ;;  %v1541_v14 = vpop.xlane.xlu0 %1540 }
 0x8b2   :  { %v1560_v13 = vadd.f32 %v3443_v26, %v1538_v63  ;;  %v1561_v39 = vadd.f32 %v3443_v26, %v1541_v14  ;;  %v1582_v43 = vmax.f32 %v1574_v17, 0.0  ;;  %v1583_v44 = vmax.f32 %v1575_v23, 0.0 }
 0x8b4   :  { %v1576_v33 = vadd.f32 %v1568_v58, %v1560_v13  ;;  %v1577_v56 = vadd.f32 %v1569_v35, %v1561_v39  ;;  %v1594_v52 = vmul.f32 %v3951_v2, %v1582_v43  ;;  %v1595_v24 = vmul.f32 %v3951_v2, %v1583_v44 }
 0x8b5   :  { %v1544_v6 = vpop.xlane.xlu1 %1543  ;;  %v1547_v34 = vpop.xlane.xlu0 %1546 }
 0x8b6   :  { %v1562_v10 = vadd.f32 %v3443_v26, %v1544_v6  ;;  %v1584_v22 = vmax.f32 %v1576_v33, 0.0  ;;  %v1563_v25 = vadd.f32 %v3443_v26, %v1547_v34  ;;  %v1585_v12 = vmax.f32 %v1577_v56, 0.0 }
 0x8b7   :  { %v1614_v38 = vadd.f32 %v3448_v27, %v1594_v52  ;;  %v1615_v6 = vadd.f32 %v3448_v27, %v1595_v24 }
 0x8b8   :  { %v1578_v55 = vadd.f32 %v1570_v47, %v1562_v10  ;;  %v1596_v36 = vmul.f32 %v3951_v2, %v1584_v22  ;;  %v1579_v49 = vadd.f32 %v1571_v60, %v1563_v25  ;;  %v1597_v53 = vmul.f32 %v3951_v2, %v1585_v12 }
 0x8b9   :  { %v3942_v0 = vpop.xlane.xlu1 %1899  ;;  %v1553_v1 = vpop.xlane.xlu0 %1552  ;;  %v2620_v30 = vmul.f32 -1.442695, %v1614_v38  ;;  %v2621_v43 = vmul.f32 -1.442695, %v1615_v6 }
 0x8ba   :  { %v1565_v57 = vadd.f32 %v3443_v26, %v1553_v1  ;;  %v1586_v63 = vmax.f32 %v1578_v55, 0.0  ;;  %v1616_v42 = vadd.f32 %v3448_v27, %v1596_v36  ;;  %v1587_v17 = vmax.f32 %v1579_v49, 0.0 }
 0x8bb   :  { %v1617_v33 = vadd.f32 %v3448_v27, %v1597_v53  ;;  %3134 = vpow2.f32 %v2620_v30 }
 0x8bc   :  { %v1581_v13 = vadd.f32 %v1573_v51, %v1565_v57  ;;  %v1598_v23 = vmul.f32 %v3951_v2, %v1586_v63  ;;  %v2622_v10 = vmul.f32 -1.442695, %v1616_v42  ;;  %3136 = vpow2.f32 %v2621_v43 }
 0x8bd   :  { %v1550_v40 = vpop.xlane.xlu1 %1549  ;;  %v2623_v24 = vmul.f32 -1.442695, %v1617_v33 }
 0x8be   :  { %v1564_v59 = vadd.f32 %v3443_v26, %v1550_v40  ;;  %v1599_v40 = vmul.f32 %v3951_v2, %v1587_v17  ;;  %v1589_v47 = vmax.f32 %v1581_v13, 0.0  ;;  %v1618_v25 = vadd.f32 %v3448_v27, %v1598_v23 }
 0x8bf   :  { %3138 = vpow2.f32 %v2622_v10 }
 0x8c0   :  { %v1580_v9 = vadd.f32 %v1572_v16, %v1564_v59  ;;  %v1619_v36 = vadd.f32 %v3448_v27, %v1599_v40  ;;  %3140 = vpow2.f32 %v2623_v24 }
 0x8c2   :  { %v1588_v39 = vmax.f32 %v1580_v9, 0.0  ;;  %v2625_v30 = vmul.f32 -1.442695, %v1619_v36  ;;  %v1920_v36 = vmul.f32 0.125, %v3942_v0 }
 0x8c4   :  { %v1600_v55 = vmul.f32 %v3951_v2, %v1588_v39 }
 0x8c6   :  { %v1620_v63 = vadd.f32 %v3448_v27, %v1600_v55 }
 0x8c8   :  { %v2626_v17 = vmul.f32 -1.442695, %v1620_v63 }
 0x937   :  { %v3011_v62 = vpop.f32.mrb[26].mxu1 }
 0x938   :  { %v2340_v8 = vadd.f32 %v3011_v62, %v3871_v54  ;;  %v2300_v50 = vpop.f32.mrb[27].mxu1  ;;  %v1601_v62 = vmul.f32 %v3951_v2, %v1589_v47 }
 0x939   :  { %v2339_v48 = vadd.f32 %v2300_v50, %v3871_v54  ;;  %v2624_v50 = vmul.f32 -1.442695, %v1618_v25 }
 0x93a   :  { %v2348_v31 = vmax.f32 %v2340_v8, 0.0 }
 0x93b   :  { %v2347_v14 = vmax.f32 %v2339_v48, 0.0  ;;  %v3014_v37 = vpop.f32.mrb[28].mxu1  ;;  %3142 = vpow2.f32 %v2624_v50 }
 0x93c   :  { %v2342_v11 = vadd.f32 %v3014_v37, %v3871_v54  ;;  %v2310_v15 = vpop.f32.mrb[29].mxu1  ;;  %v2356_v58 = vmul.f32 %v2348_v31, %v3885_v46  ;;  %v1621_v37 = vadd.f32 %v3448_v27, %v1601_v62  ;;  %3144 = vpow2.f32 %v2625_v30 }
 0x93d   :  { %v2341_v45 = vadd.f32 %v2310_v15, %v3871_v54  ;;  %v2355_v21 = vmul.f32 %v2347_v14, %v3885_v46  ;;  %v3135_v14 = vpop.eup %3134  ;;  %3146 = vpow2.f32 %v2626_v17 }
 0x93e   :  { %v2350_v34 = vmax.f32 %v2342_v11, 0.0  ;;  %v2366_v35 = vsel %vm348_vm2, %v2356_v58, 0.0  ;;  %v3137_v15 = vpop.eup %3136  ;;  %v2627_v23 = vmul.f32 -1.442695, %v1621_v37  ;;  %v1646_v39 = vadd.f32 1.0, %v3135_v14 }
 0x93f   :  { %v2349_v32 = vmax.f32 %v2341_v45, 0.0  ;;  %2367 = vadd.xlane.f32.xlu0 %v2366_v35  ;;  %v3017_v44 = vpop.f32.mrb[30].mxu1  ;;  %v2363_v56 = vsel %vm348_vm2, %v2355_v21, 0.0  ;;  %v3139_v58 = vpop.eup %3138  ;;  %v1647_v45 = vadd.f32 1.0, %v3137_v15 }
 0x940   :  { %v2344_v41 = vadd.f32 %v3017_v44, %v3871_v54  ;;  %v2320_v52 = vpop.f32.mrb[31].mxu1  ;;  %2364 = vadd.xlane.f32.xlu1 %v2363_v56  ;;  %v2358_v22 = vmul.f32 %v2350_v34, %v3885_v46  ;;  %3148 = vpow2.f32 %v2627_v23  ;;  %v3141_v21 = vpop.eup %3140  ;;  %v1648_v43 = vadd.f32 1.0, %v3139_v58 }
 0x941   :  { %v2343_v1 = vadd.f32 %v2320_v52, %v3871_v54  ;;  %v2357_v59 = vmul.f32 %v2349_v32, %v3885_v46  ;;  %3150 = vrcp.f32 %v1646_v39 }
 0x942   :  { %v2352_v60 = vmax.f32 %v2344_v41, 0.0  ;;  %v2372_v61 = vsel %vm348_vm2, %v2358_v22, 0.0  ;;  %3152 = vrcp.f32 %v1647_v45 }
 0x943   :  { %v2351_v12 = vmax.f32 %v2343_v1, 0.0  ;;  %2373 = vadd.xlane.f32.xlu0 %v2372_v61  ;;  %v3020_v16 = vpop.f32.mrb[32].mxu1  ;;  %v2369_v38 = vsel %vm348_vm2, %v2357_v59, 0.0  ;;  %3154 = vrcp.f32 %v1648_v43  ;;  %v1906_v61 = vpop.xlane.xlu1 %1905 }
 0x944   :  { %v2346_v49 = vadd.f32 %v3020_v16, %v3871_v54  ;;  %v2330_v57 = vpop.f32.mrb[33].mxu1  ;;  %2370 = vadd.xlane.f32.xlu1 %v2369_v38  ;;  %v2360_v8 = vmul.f32 %v2352_v60, %v3885_v46  ;;  %v1897_v60 = vpop.xlane.xlu0 %1896  ;;  %v1922_v50 = vmul.f32 0.125, %v1906_v61 }
 0x945   :  { %v2345_v9 = vadd.f32 %v2330_v57, %v3871_v54  ;;  %v2359_v48 = vmul.f32 %v2351_v12, %v3885_v46  ;;  %v3143_v33 = vpop.eup %3142 }
 0x946   :  { %v2354_v51 = vmax.f32 %v2346_v49, 0.0  ;;  %v2378_v6 = vsel %vm348_vm2, %v2360_v8, 0.0  ;;  %v3145_v34 = vpop.eup %3144  ;;  %v1650_v35 = vadd.f32 1.0, %v3143_v33  ;;  %v1919_v49 = vmul.f32 0.125, %v1897_v60 }
 0x947   :  { %v2353_v53 = vmax.f32 %v2345_v9, 0.0  ;;  %2379 = vadd.xlane.f32.xlu0 %v2378_v6  ;;  %v2375_v31 = vsel %vm348_vm2, %v2359_v48, 0.0  ;;  %v3147_v10 = vpop.eup %3146  ;;  %v1651_v32 = vadd.f32 1.0, %v3145_v34  ;;  %v1912_v12 = vpop.xlane.xlu1 %1911  ;;  %v2396_v8 = vmul.f32 %v1920_v36, %v3832_v28 }
 0x948   :  { %2376 = vadd.xlane.f32.xlu1 %v2375_v31  ;;  %v2362_v42 = vmul.f32 %v2354_v51, %v3885_v46  ;;  %v1652_v44 = vadd.f32 1.0, %v3147_v10  ;;  %v1903_v24 = vpop.xlane.xlu0 %1902  ;;  %v2395_v48 = vmul.f32 %v1919_v49, %v3832_v28  ;;  %v1924_v0 = vmul.f32 0.125, %v1912_v12 }
 0x949   :  { %v2361_v54 = vmul.f32 %v2353_v53, %v3885_v46  ;;  %v1649_v46 = vadd.f32 1.0, %v3141_v21  ;;  %v1921_v51 = vmul.f32 0.125, %v1903_v24 }
 0x94a   :  { %v2384_v13 = vsel %vm348_vm2, %v2362_v42, 0.0  ;;  %v3149_v56 = vpop.eup %3148  ;;  %v2398_v42 = vmul.f32 %v1922_v50, %v3832_v28 }
 0x94b   :  { %2385 = vadd.xlane.f32.xlu0 %v2384_v13  ;;  %v2381_v11 = vsel %vm348_vm2, %v2361_v54, 0.0  ;;  %3156 = vrcp.f32 %v1649_v46  ;;  %v3151_v40 = vpop.eup %3150  ;;  %v1653_v47 = vadd.f32 1.0, %v3149_v56  ;;  %v1918_v62 = vpop.xlane.xlu1 %1917  ;;  %v2397_v54 = vmul.f32 %v1921_v51, %v3832_v28 }
 0x94c   :  { %2382 = vadd.xlane.f32.xlu1 %v2381_v11  ;;  %3158 = vrcp.f32 %v1650_v35  ;;  %v3153_v41 = vpop.eup %3152  ;;  %v1909_v16 = vpop.xlane.xlu0 %1908  ;;  %v1926_v58 = vmul.f32 0.125, %v1918_v62  ;;  %v2400_v46 = vmul.f32 %v1924_v0, %v3832_v28 }
 0x94d   :  { %3160 = vrcp.f32 %v1651_v32  ;;  %v3155_v52 = vpop.eup %3154  ;;  %v1923_v13 = vmul.f32 0.125, %v1909_v16 }
 0x94e   :  { %3162 = vrcp.f32 %v1652_v44 }
 0x94f   :  { %3164 = vrcp.f32 %v1653_v47  ;;  %v2399_v44 = vmul.f32 %v1923_v13, %v3832_v28 }
 0x950   :  { %v1915_v38 = vpop.xlane.xlu0 %1914 }
 0x951   :  { %v1925_v45 = vmul.f32 0.125, %v1915_v38 }
 0x955   :  { %v3157_v22 = vpop.eup %3156 }
 0x956   :  { %v3159_v25 = vpop.eup %3158 }
 0x957   :  { %v3161_v55 = vpop.eup %3160 }
 0x958   :  { %v3163_v1 = vpop.eup %3162 }
 0x959   :  { %v3165_v59 = vpop.eup %3164 }
 0x95d   :  { %1672 = vperm.xlu1 %3129, %v3151_v40  }
 0x961   :  { %1677 = vperm.xlu0 %3125, %v3153_v41   ;;  %1682 = vperm.xlu1 %3129, %v3155_v52   ;;  %v2402_v41 = vmul.f32 %v1926_v58, %v3832_v28 }
 0x965   :  { %1692 = vperm.xlu0 %3125, %v3159_v25   ;;  %1687 = vperm.xlu1 %3129, %v3157_v22  }
 0x969   :  { %1697 = vperm.xlu1 %3129, %v3161_v55   ;;  %1702 = vperm.xlu0 %3125, %v3163_v1   ;;  %v2401_v55 = vmul.f32 %v1925_v45, %v3832_v28 }
 0x96d   :  { %1707 = vperm.xlu1 %3129, %v3165_v59  }
 0x9cc   :  { %v2368_v57 = vpop.xlane.xlu0 %2367 }
 0x9cd   :  { %v2388_v63 = vadd.f32 %v2368_v57, %v3443_v26  ;;  %v2365_v9 = vpop.xlane.xlu1 %2364 }
 0x9ce   :  { %v2387_v6 = vadd.f32 %v2365_v9, %v3443_v26 }
 0x9cf   :  { %v2404_v53 = vadd.f32 %v2396_v8, %v2388_v63 }
 0x9d0   :  { %v2403_v31 = vadd.f32 %v2395_v48, %v2387_v6  ;;  %v2374_v30 = vpop.xlane.xlu0 %2373 }
 0x9d1   :  { %v2412_v14 = vmax.f32 %v2404_v53, 0.0  ;;  %v2390_v37 = vadd.f32 %v2374_v30, %v3443_v26  ;;  %v2371_v17 = vpop.xlane.xlu1 %2370 }
 0x9d2   :  { %v2411_v11 = vmax.f32 %v2403_v31, 0.0  ;;  %v2389_v15 = vadd.f32 %v2371_v17, %v3443_v26 }
 0x9d3   :  { %v2420_v23 = vmul.f32 %v2412_v14, %v3951_v2  ;;  %v2406_v39 = vadd.f32 %v2398_v42, %v2390_v37 }
 0x9d4   :  { %v2419_v21 = vmul.f32 %v2411_v11, %v3951_v2  ;;  %v2405_v43 = vadd.f32 %v2397_v54, %v2389_v15  ;;  %v2380_v33 = vpop.xlane.xlu0 %2379 }
 0x9d5   :  { %v2436_v34 = vadd.f32 %v2420_v23, %v3448_v27  ;;  %v2414_v35 = vmax.f32 %v2406_v39, 0.0  ;;  %v2392_v10 = vadd.f32 %v2380_v33, %v3443_v26  ;;  %v2377_v32 = vpop.xlane.xlu1 %2376 }
 0x9d6   :  { %v2435_v56 = vadd.f32 %v2419_v21, %v3448_v27  ;;  %v2413_v40 = vmax.f32 %v2405_v43, 0.0  ;;  %v2391_v47 = vadd.f32 %v2377_v32, %v3443_v26 }
 0x9d7   :  { %v2660_v52 = vmul.f32 -1.442695, %v2436_v34  ;;  %v2422_v22 = vmul.f32 %v2414_v35, %v3951_v2  ;;  %v2408_v25 = vadd.f32 %v2400_v46, %v2392_v10 }
 0x9d8   :  { %v2659_v1 = vmul.f32 -1.442695, %v2435_v56  ;;  %v2421_v59 = vmul.f32 %v2413_v40, %v3951_v2  ;;  %v2407_v60 = vadd.f32 %v2399_v44, %v2391_v47  ;;  %v2386_v61 = vpop.xlane.xlu0 %2385 }
 0x9d9   :  { %3166 = vpow2.f32 %v2660_v52  ;;  %v2438_v24 = vadd.f32 %v2422_v22, %v3448_v27  ;;  %v2416_v12 = vmax.f32 %v2408_v25, 0.0  ;;  %v2394_v16 = vadd.f32 %v2386_v61, %v3443_v26  ;;  %v2383_v38 = vpop.xlane.xlu1 %2382 }
 0x9da   :  { %3168 = vpow2.f32 %v2659_v1  ;;  %v2437_v36 = vadd.f32 %v2421_v59, %v3448_v27  ;;  %v2415_v62 = vmax.f32 %v2407_v60, 0.0  ;;  %v2393_v49 = vadd.f32 %v2383_v38, %v3443_v26 }
 0x9db   :  { %v2662_v57 = vmul.f32 -1.442695, %v2438_v24  ;;  %v2424_v28 = vmul.f32 %v2416_v12, %v3951_v2  ;;  %v2410_v8 = vadd.f32 %v2402_v41, %v2394_v16 }
 0x9dc   :  { %v2661_v50 = vmul.f32 -1.442695, %v2437_v36  ;;  %v2423_v63 = vmul.f32 %v2415_v62, %v3951_v2  ;;  %v2409_v9 = vadd.f32 %v2401_v55, %v2393_v49 }
 0x9dd   :  { %3170 = vpow2.f32 %v2662_v57  ;;  %v2440_v48 = vadd.f32 %v2424_v28, %v3448_v27  ;;  %v2418_v51 = vmax.f32 %v2410_v8, 0.0  ;;  %v1673_v22 = vpop.permute.xlu1 %1672 }
 0x9de   :  { %3172 = vpow2.f32 %v2661_v50  ;;  %v2439_v6 = vadd.f32 %v2423_v63, %v3448_v27  ;;  %v2417_v53 = vmax.f32 %v2409_v9, 0.0  ;;  %v1710_v62 = vmul.f32 %v1673_v22, %v3541_v18 }
 0x9df   :  { %v2664_v31 = vmul.f32 -1.442695, %v2440_v48  ;;  %v2426_v30 = vmul.f32 %v2418_v51, %v3951_v2 }
 0x9e0   :  { %v2663_v26 = vmul.f32 -1.442695, %v2439_v6  ;;  %v2425_v42 = vmul.f32 %v2417_v53, %v3951_v2  ;;  %v1678_v1 = vpop.permute.xlu0 %1677 }
 0x9e1   :  { %3174 = vpow2.f32 %v2664_v31  ;;  %v2442_v0 = vadd.f32 %v2426_v30, %v3448_v27  ;;  %v1683_v25 = vpop.permute.xlu1 %1682  ;;  %v1711_v16 = vmul.f32 %v1678_v1, %v3544_v19 }
 0x9e2   :  { %3176 = vpow2.f32 %v2663_v26  ;;  %v2441_v14 = vadd.f32 %v2425_v42, %v3448_v27  ;;  %v1712_v48 = vmul.f32 %v1683_v25, %v3549_v20 }
 0x9e3   :  { %v3167_v37 = vpop.eup %3166  ;;  %v2666_v17 = vmul.f32 -1.442695, %v2442_v0 }
 0x9e4   :  { %v3169_v54 = vpop.eup %3168  ;;  %v2468_v13 = vadd.f32 1.0, %v3167_v37  ;;  %v2665_v11 = vmul.f32 -1.442695, %v2441_v14  ;;  %v1693_v60 = vpop.permute.xlu0 %1692 }
 0x9e5   :  { %v2467_v15 = vadd.f32 1.0, %v3169_v54  ;;  %3178 = vpow2.f32 %v2666_v17  ;;  %v1688_v55 = vpop.permute.xlu1 %1687  ;;  %v1714_v26 = vmul.f32 %v1693_v60, %v3559_v3 }
 0x9e6   :  { %3180 = vrcp.f32 %v2468_v13  ;;  %v1713_v50 = vmul.f32 %v1688_v55, %v3556_v29 }
 0x9e7   :  { %v3171_v58 = vpop.eup %3170  ;;  %3182 = vrcp.f32 %v2467_v15 }
 0x9e8   :  { %v3173_v23 = vpop.eup %3172  ;;  %v2470_v39 = vadd.f32 1.0, %v3171_v58  ;;  %3184 = vpow2.f32 %v2665_v11  ;;  %v1703_v24 = vpop.permute.xlu0 %1702 }
 0x9e9   :  { %v2469_v2 = vadd.f32 1.0, %v3173_v23  ;;  %v1698_v59 = vpop.permute.xlu1 %1697  ;;  %v1716_v54 = vmul.f32 %v1703_v24, %v3569_v5 }
 0x9ea   :  { %3186 = vrcp.f32 %v2470_v39  ;;  %v1715_v53 = vmul.f32 %v1698_v59, %v3566_v4 }
 0x9eb   :  { %v3175_v45 = vpop.eup %3174  ;;  %3188 = vrcp.f32 %v2469_v2 }
 0x9ec   :  { %v3177_v21 = vpop.eup %3176  ;;  %v2472_v43 = vadd.f32 1.0, %v3175_v45 }
 0x9ed   :  { %v2471_v27 = vadd.f32 1.0, %v3177_v21  ;;  %v1708_v61 = vpop.permute.xlu1 %1707 }
 0x9ee   :  { %3190 = vrcp.f32 %v2472_v43  ;;  %v1717_v14 = vmul.f32 %v1708_v61, %v3576_v7 }
 0x9ef   :  { %v3179_v33 = vpop.eup %3178  ;;  %3192 = vrcp.f32 %v2471_v27 }
 0x9f0   :  { %v3181_v46 = vpop.eup %3180  ;;  %v2474_v34 = vadd.f32 1.0, %v3179_v33 }
 0x9f1   :  { %v3183_v35 = vpop.eup %3182  ;;  %2498 = vperm.xlu1 %3129, %v3181_v46  }
 0x9f2   :  { %v3185_v10 = vpop.eup %3184  ;;  %3194 = vrcp.f32 %v2474_v34  ;;  %2493 = vperm.xlu0 %3125, %v3183_v35  }
 0x9f3   :  { %v2473_v32 = vadd.f32 1.0, %v3185_v10 }
 0x9f4   :  { %v3187_v44 = vpop.eup %3186 }
 0x9f5   :  { %v3189_v56 = vpop.eup %3188  ;;  %3196 = vrcp.f32 %v2473_v32  ;;  %2508 = vperm.xlu1 %3129, %v3187_v44  }
 0x9f6   :  { %2503 = vperm.xlu0 %3125, %v3189_v56  }
 0x9f8   :  { %v3191_v40 = vpop.eup %3190 }
 0x9f9   :  { %v3193_v47 = vpop.eup %3192  ;;  %2518 = vperm.xlu1 %3129, %v3191_v40  }
 0x9fa   :  { %2513 = vperm.xlu0 %3125, %v3193_v47  }
 0x9fc   :  { %v3195_v41 = vpop.eup %3194 }
 0x9fd   :  { %2528 = vperm.xlu1 %3129, %v3195_v41  }
 0x9ff   :  { %v3197_v52 = vpop.eup %3196 }
 0xa00   :  { %2523 = vperm.xlu0 %3125, %v3197_v52  }
 0xa70   :  { %v2499_v12 = vpop.permute.xlu1 %2498 }
 0xa71   :  { %v2532_v38 = vmul.f32 %v2499_v12, %v3544_v19  ;;  %v2494_v36 = vpop.permute.xlu0 %2493 }
 0xa72   :  { %v2531_v49 = vmul.f32 %v2494_v36, %v3541_v18 }
 0xa73   :  { %v2540_v57 = vsel %vm94_vm1, %v1711_v16, %v2532_v38 }
 0xa74   :  { %2548 = vst [vmem:[#allocation7 + $0x8] sm:$0xff] %v2540_v57  ;;  %v2539_v28 = vsel %vm94_vm1, %v1710_v62, %v2531_v49  ;;  %v2509_v8 = vpop.permute.xlu1 %2508 }
 0xa75   :  { %2547 = vst [vmem:[#allocation7] sm:$0xff] %v2539_v28  ;;  %v2534_v63 = vmul.f32 %v2509_v8, %v3556_v29  ;;  %v2504_v9 = vpop.permute.xlu0 %2503 }
 0xa76   :  { %v2533_v19 = vmul.f32 %v2504_v9, %v3549_v20 }
 0xa77   :  { %v2542_v51 = vsel %vm94_vm1, %v1713_v50, %v2534_v63 }
 0xa78   :  { %2550 = vst [vmem:[#allocation7 + $0x18] sm:$0xff] %v2542_v51  ;;  %v2541_v18 = vsel %vm94_vm1, %v1712_v48, %v2533_v19  ;;  %v2519_v6 = vpop.permute.xlu1 %2518 }
 0xa79   :  { %2549 = vst [vmem:[#allocation7 + $0x10] sm:$0xff] %v2541_v18  ;;  %v2536_v31 = vmul.f32 %v2519_v6, %v3566_v4  ;;  %v2514_v30 = vpop.permute.xlu0 %2513 }
 0xa7a   :  { %v2535_v29 = vmul.f32 %v2514_v30, %v3559_v3 }
 0xa7b   :  { %v2544_v42 = vsel %vm94_vm1, %v1715_v53, %v2536_v31 }
 0xa7c   :  { %2552 = vst [vmem:[#allocation7 + $0x28] sm:$0xff] %v2544_v42  ;;  %v2543_v20 = vsel %vm94_vm1, %v1714_v26, %v2535_v29  ;;  %v2529_v0 = vpop.permute.xlu1 %2528 }
 0xa7d   :  { %2551 = vst [vmem:[#allocation7 + $0x20] sm:$0xff] %v2543_v20  ;;  %v2538_v37 = vmul.f32 %v2529_v0, %v3576_v7 }
 0xa7f   :  { %v2546_v4 = vsel %vm94_vm1, %v1717_v14, %v2538_v37  ;;  %v2524_v17 = vpop.permute.xlu0 %2523 }
 0xa80   :  { %2554 = vst [vmem:[#allocation7 + $0x38] sm:$0xff] %v2546_v4  ;;  %v2537_v3 = vmul.f32 %v2524_v17, %v3569_v5 }
 0xa82   :  { %v2545_v13 = vsel %vm94_vm1, %v1716_v54, %v2537_v3 }
 0xa83   :  { %2553 = vst [vmem:[#allocation7 + $0x30] sm:$0xff] %v2545_v13 }
 0xa84   :  { %3254 = shalt.err (!%p3251_p6)
}
 0xa85   :  { %s3255_s10 = scalar_lea.hbm %s4082_s8, 1024 }
 0xa86   :  { %p3256_p7 = scmp.ne.s32.totalorder %s4082_s8, %s3255_s10  ;;  %p3259_p8 = scmp.lt.u32.totalorder %s3255_s10, %s4082_s8 }
 0xa88   :  { %p3261_p9 = pnand %p3259_p8, %p3256_p7 }
 0xa8a   :  { %3264 = shalt.err (!%p3261_p9)
}
 0xa8b   :  { %2566 = dma.vmem_to_hbm [thread:$0]  %s2561_s28, 1024, %s4082_s8, [#allocation4], %s3272_s15, %s3272_s15, %s3273_s16  }
 0xa8c   :  { %3269 = dma.done.wait [#allocation4], 1024  }
 0xa8d   :  { %3270 = vsyncadd [#allocation4], 4294966272 }
 0xa8e   :  { %2570 = vsyncpa [#allocation3], 1 }
 0xa8f   :  { %2571 = vsyncpa [#allocation6], 1 }
 0xa90   :  { %2572 = vsyncpa [#allocation4], 1 }

</bundles_post_ra>
